<compile_context>
chip_gen: v7x
topology: tpu7x:2x2x1
jax: 0.10.0
libtpu: 0.0.40
codegen_flags: <defaults>
</compile_context>

<pallas_src>
import functools

import jax
import jax.numpy as jnp
from jax.experimental import pallas as pl
from jax.experimental.pallas import tpu as pltpu


def _make_kernel(num_layers: int, hidden_dim: int, seq_len: int, batch: int):
    H, L, S, B = hidden_dim, num_layers, seq_len, batch
    G = 4 * H
    BF = jnp.bfloat16

    def kernel(x_ref, w1_ref, b1_ref, wih0_ref, wwave_ref, biasf_ref,
               w2_ref, b2_ref, o_ref):
        # ---- fc1 + ReLU over ALL timesteps at once: (S*B, 64) ------------
        feat = jnp.maximum(
            jnp.dot(x_ref[...].astype(BF), w1_ref[...],
                    preferred_element_type=jnp.float32) + b1_ref[...],
            0.0)

        # ---- layer-0 input projection hoisted over time: (S*B, 4H) -------
        # (g-gate columns of wih0 are pre-scaled x2 for the fused-sigmoid trick)
        gx0 = jnp.dot(feat.astype(BF), wih0_ref[...],
                      preferred_element_type=jnp.float32)

        wwave = wwave_ref[...]                                  # (L*H, L*4H) bf16
        bias_b = jnp.broadcast_to(biasf_ref[...], (B, L * G))   # hoisted broadcast

        # ---- hoisted per-diagonal additive terms (gx0 slice + biases) ----
        # Keeps sublane extracts / lane pads / broadcasts off the serial
        # recurrence chain; LLO can overlap them with the prologue matmuls.
        add_terms = []
        if L > 1:
            zrest = jnp.zeros((B, (L - 1) * G), jnp.float32)
        for t in range(S):
            gsl = gx0[t * B:(t + 1) * B, :]
            padded = (jnp.concatenate([gsl, zrest], axis=1) if L > 1 else gsl)
            add_terms.append(padded + bias_b)
        for _ in range(L - 1):
            add_terms.append(bias_b)

        # g-gate lane mask (hoisted constant): lanes [2H, 3H) within each
        # layer's 4H gate block.
        lane = jax.lax.broadcasted_iota(jnp.int32, (B, L * G), 1)
        pos = lane % G
        g_mask = jnp.logical_and(pos >= 2 * H, pos < 3 * H)

        h = [jnp.zeros((B, H), jnp.float32) for _ in range(L)]
        c = [jnp.zeros((B, H), jnp.float32) for _ in range(L)]

        # ---- wavefront recurrence: diagonal d runs (layer l, time d-l) ----
        # One fused block-diagonal matmul + ONE full-width sigmoid per diagonal.
        n_diag = S + L - 1
        for d in range(n_diag):
            if d == 0:
                gates_full = add_terms[0]            # all h/c are zero at d=0
            else:
                hcat = (jnp.concatenate(h, axis=1) if L > 1 else h[0]).astype(BF)
                gates_full = add_terms[d] + jnp.dot(
                    hcat, wwave, preferred_element_type=jnp.float32)

            # single full-width sigmoid; g lanes fixed as tanh(x)=2*sigmoid(2x)-1
            sg = jax.nn.sigmoid(gates_full)
            act = jnp.where(g_mask, 2.0 * sg - 1.0, sg)

            for l in range(L):
                t = d - l
                if 0 <= t < S:
                    gl = act[:, l * G:(l + 1) * G]
                    i_g = gl[:, 0 * H:1 * H]
                    f_g = gl[:, 1 * H:2 * H]
                    g_g = gl[:, 2 * H:3 * H]
                    o_g = gl[:, 3 * H:4 * H]
                    c[l] = f_g * c[l] + i_g * g_g
                    h[l] = o_g * jnp.tanh(c[l])

        # ---- dropout (identity at inference) + fc2 on last time step -----
        o_ref[...] = (
            jnp.dot(h[L - 1].astype(BF), w2_ref[...],
                    preferred_element_type=jnp.float32) + b2_ref[...]
        ).astype(o_ref.dtype)

    return kernel


def _prepare_params(params, num_layers, hidden_dim):
    """Cast matmul weights to bf16, build the block-diagonal wavefront weight,
    fuse b_ih+b_hh per layer, and fold the x2 of tanh(x)=2*sigmoid(2x)-1 into
    the g-gate columns of every weight/bias (exact in bf16)."""
    H, L = hidden_dim, num_layers
    G = 4 * H
    BF = jnp.bfloat16
    lstm = params["lstm"]

    gscale = jnp.ones((G,), jnp.float32).at[2 * H:3 * H].set(2.0)

    wih0 = lstm[0] * gscale                                   # (64, 4H)
    wwave = jnp.zeros((L * H, L * G), jnp.float32)
    biases = []
    for l in range(L):
        wih, whh, bih, bhh = lstm[4 * l:4 * l + 4]
        wwave = wwave.at[l * H:(l + 1) * H, l * G:(l + 1) * G].set(whh * gscale)
        if l >= 1:
            wwave = wwave.at[(l - 1) * H:l * H, l * G:(l + 1) * G].set(wih * gscale)
        biases.append((bih + bhh).reshape(1, G) * gscale)
    bias_full = jnp.concatenate(biases, axis=1).astype(jnp.float32)

    return [params["w1"].astype(BF),
            params["b1"].reshape(1, -1).astype(jnp.float32),
            wih0.astype(BF),
            wwave.astype(BF),
            bias_full,
            params["w2"].astype(BF),
            params["b2"].reshape(1, -1).astype(jnp.float32)]


def improved_lstm_forward(x, params, *, hidden_dim, num_layers, output_dim):
    """x: (B, S, D_in) float32. Returns (B, output_dim) float32."""
    B, S, D_in = x.shape
    # time-major, flattened to (S*B, D_in) so fc1 covers all steps at once
    x_flat = jnp.transpose(x, (1, 0, 2)).reshape(S * B, D_in)

    flat_params = _prepare_params(params, num_layers, hidden_dim)
    kernel = _make_kernel(num_layers, hidden_dim, S, B)

    n_in = 1 + len(flat_params)
    in_specs = [pl.BlockSpec(memory_space=pltpu.MemorySpace.VMEM)
                for _ in range(n_in)]
    out = pl.pallas_call(
        kernel,
        out_shape=jax.ShapeDtypeStruct((B, output_dim), jnp.float32),
        in_specs=in_specs,
        out_specs=pl.BlockSpec(memory_space=pltpu.MemorySpace.VMEM),
    )(x_flat, *flat_params)
    return out


def _reference_forward(x, params, *, hidden_dim, num_layers):
    """Pure-JAX reference (same bf16-operand / f32-accum convention,
    conventional sigmoid/tanh gates — cross-checks the kernel's fused math)."""
    BF = jnp.bfloat16
    B, S, _ = x.shape
    H = hidden_dim

    def mm(a, w):
        return jnp.dot(a.astype(BF), w.astype(BF),
                       preferred_element_type=jnp.float32)

    feat = jax.nn.relu(
        mm(x.reshape(B * S, -1), params["w1"]).reshape(B, S, -1)
        + params["b1"])

    h = [jnp.zeros((B, H), jnp.float32) for _ in range(num_layers)]
    c = [jnp.zeros((B, H), jnp.float32) for _ in range(num_layers)]
    last = None
    for t in range(S):
        layer_in = feat[:, t, :]
        for l in range(num_layers):
            wih, whh, bih, bhh = params["lstm"][4 * l:4 * l + 4]
            g = mm(layer_in, wih) + mm(h[l], whh) + bih + bhh
            i_g = jax.nn.sigmoid(g[:, 0 * H:1 * H])
            f_g = jax.nn.sigmoid(g[:, 1 * H:2 * H])
            g_g = jnp.tanh(g[:, 2 * H:3 * H])
            o_g = jax.nn.sigmoid(g[:, 3 * H:4 * H])
            c[l] = f_g * c[l] + i_g * g_g
            h[l] = o_g * jnp.tanh(c[l])
            layer_in = h[l]
        last = layer_in
    return mm(last, params["w2"]) + params["b2"]


def _init_params(key, input_dim, hidden_dim, output_dim, num_layers):
    H = hidden_dim
    keys = jax.random.split(key, 8 + 4 * num_layers)
    ki = iter(keys)
    scale = 0.1

    def rnd(shape):
        return scale * jax.random.normal(next(ki), shape, dtype=jnp.float32)

    params = {
        "w1": rnd((input_dim, 64)),
        "b1": rnd((1, 64)),
        "w2": rnd((H, output_dim)),
        "b2": rnd((1, output_dim)),
        "lstm": [],
    }
    for l in range(num_layers):
        in_dim = 64 if l == 0 else H
        # stored transposed relative to PyTorch (in_dim, 4H); gate order i,f,g,o
        params["lstm"].append(rnd((in_dim, 4 * H)))   # W_ih^T
        params["lstm"].append(rnd((H, 4 * H)))        # W_hh^T
        params["lstm"].append(rnd((1, 4 * H)))        # b_ih
        params["lstm"].append(rnd((1, 4 * H)))        # b_hh
    return params


if __name__ == "__main__":
    B, S = 2, 8
    input_dim, hidden_dim, output_dim, num_layers = 16, 32, 4, 2

    key = jax.random.PRNGKey(0)
    kx, kp = jax.random.split(key)
    x = jax.random.normal(kx, (B, S, input_dim), dtype=jnp.float32)
    params = _init_params(kp, input_dim, hidden_dim, output_dim, num_layers)

    fwd = functools.partial(
        improved_lstm_forward,
        hidden_dim=hidden_dim, num_layers=num_layers, output_dim=output_dim)

    out = jax.block_until_ready(fwd(x, params))
    ref = _reference_forward(x, params, hidden_dim=hidden_dim,
                             num_layers=num_layers)

    assert out.shape == (B, output_dim)
    assert jnp.allclose(out, ref, atol=5e-3, rtol=5e-3), (out, ref)
    print("KERNEL_OK")
</pallas_src>

<mosaic_0001>
module attributes {stable_mosaic.version = 11 : i64} {
  func.func @kernel(%arg0: memref<16x16xf32, #tpu.memory_space<vmem>>, %arg1: memref<16x64xbf16, #tpu.memory_space<vmem>>, %arg2: memref<1x64xf32, #tpu.memory_space<vmem>>, %arg3: memref<64x128xbf16, #tpu.memory_space<vmem>>, %arg4: memref<64x256xbf16, #tpu.memory_space<vmem>>, %arg5: memref<1x256xf32, #tpu.memory_space<vmem>>, %arg6: memref<32x4xbf16, #tpu.memory_space<vmem>>, %arg7: memref<1x4xf32, #tpu.memory_space<vmem>>, %arg8: memref<2x4xf32, #tpu.memory_space<vmem>>) attributes {dimension_semantics = [], scalar_prefetch = 0 : i64, scratch_operands = 0 : i64, tpu.core_type = #tpu.core_type<tc>} {
    %c0 = arith.constant 0 : index
    %c0_0 = arith.constant 0 : index
    %0 = vector.load %arg0[%c0, %c0_0] : memref<16x16xf32, #tpu.memory_space<vmem>>, vector<16x16xf32>
    %1 = arith.truncf %0 : vector<16x16xf32> to vector<16x16xbf16>
    %c0_1 = arith.constant 0 : index
    %c0_2 = arith.constant 0 : index
    %2 = vector.load %arg1[%c0_1, %c0_2] : memref<16x64xbf16, #tpu.memory_space<vmem>>, vector<16x64xbf16>
    %cst = arith.constant dense<0.000000e+00> : vector<16x64xf32>
    %3 = tpu.matmul %1, %2, %cst {dimension_numbers = #tpu.dot_dimension_numbers<[1], [0], [0], [1], [0, 0, 1, 1], [], []>} : vector<16x16xbf16>, vector<16x64xbf16>, vector<16x64xf32> -> vector<16x64xf32>
    %c0_3 = arith.constant 0 : index
    %c0_4 = arith.constant 0 : index
    %4 = vector.load %arg2[%c0_3, %c0_4] : memref<1x64xf32, #tpu.memory_space<vmem>>, vector<1x64xf32>
    %5 = vector.broadcast %4 : vector<1x64xf32> to vector<16x64xf32>
    %6 = arith.addf %3, %5 : vector<16x64xf32>
    %cst_5 = arith.constant 0.000000e+00 : f32
    %7 = vector.broadcast %cst_5 : f32 to vector<16x64xf32>
    %8 = arith.maximumf %6, %7 : vector<16x64xf32>
    %9 = arith.truncf %8 : vector<16x64xf32> to vector<16x64xbf16>
    %c0_6 = arith.constant 0 : index
    %c0_7 = arith.constant 0 : index
    %10 = vector.load %arg3[%c0_6, %c0_7] : memref<64x128xbf16, #tpu.memory_space<vmem>>, vector<64x128xbf16>
    %cst_8 = arith.constant dense<0.000000e+00> : vector<16x128xf32>
    %11 = tpu.matmul %9, %10, %cst_8 {dimension_numbers = #tpu.dot_dimension_numbers<[1], [0], [0], [1], [0, 0, 1, 1], [], []>} : vector<16x64xbf16>, vector<64x128xbf16>, vector<16x128xf32> -> vector<16x128xf32>
    %c0_9 = arith.constant 0 : index
    %c0_10 = arith.constant 0 : index
    %12 = vector.load %arg4[%c0_9, %c0_10] : memref<64x256xbf16, #tpu.memory_space<vmem>>, vector<64x256xbf16>
    %c0_11 = arith.constant 0 : index
    %c0_12 = arith.constant 0 : index
    %13 = vector.load %arg5[%c0_11, %c0_12] : memref<1x256xf32, #tpu.memory_space<vmem>>, vector<1x256xf32>
    %14 = vector.shape_cast %13 : vector<1x256xf32> to vector<1x256xf32>
    %15 = vector.broadcast %14 : vector<1x256xf32> to vector<2x256xf32>
    %cst_13 = arith.constant 0.000000e+00 : f32
    %16 = vector.broadcast %cst_13 : f32 to vector<2x128xf32>
    %17 = vector.extract_strided_slice %11 {offsets = [0, 0], sizes = [2, 128], strides = [1, 1]} : vector<16x128xf32> to vector<2x128xf32>
    %18 = tpu.concatenate %17, %16 in 1 : vector<2x128xf32>, vector<2x128xf32> -> vector<2x256xf32>
    %19 = arith.addf %18, %15 : vector<2x256xf32>
    %20 = vector.extract_strided_slice %11 {offsets = [2, 0], sizes = [2, 128], strides = [1, 1]} : vector<16x128xf32> to vector<2x128xf32>
    %21 = tpu.concatenate %20, %16 in 1 : vector<2x128xf32>, vector<2x128xf32> -> vector<2x256xf32>
    %22 = arith.addf %21, %15 : vector<2x256xf32>
    %23 = vector.extract_strided_slice %11 {offsets = [4, 0], sizes = [2, 128], strides = [1, 1]} : vector<16x128xf32> to vector<2x128xf32>
    %24 = tpu.concatenate %23, %16 in 1 : vector<2x128xf32>, vector<2x128xf32> -> vector<2x256xf32>
    %25 = arith.addf %24, %15 : vector<2x256xf32>
    %26 = vector.extract_strided_slice %11 {offsets = [6, 0], sizes = [2, 128], strides = [1, 1]} : vector<16x128xf32> to vector<2x128xf32>
    %27 = tpu.concatenate %26, %16 in 1 : vector<2x128xf32>, vector<2x128xf32> -> vector<2x256xf32>
    %28 = arith.addf %27, %15 : vector<2x256xf32>
    %29 = vector.extract_strided_slice %11 {offsets = [8, 0], sizes = [2, 128], strides = [1, 1]} : vector<16x128xf32> to vector<2x128xf32>
    %30 = tpu.concatenate %29, %16 in 1 : vector<2x128xf32>, vector<2x128xf32> -> vector<2x256xf32>
    %31 = arith.addf %30, %15 : vector<2x256xf32>
    %32 = vector.extract_strided_slice %11 {offsets = [10, 0], sizes = [2, 128], strides = [1, 1]} : vector<16x128xf32> to vector<2x128xf32>
    %33 = tpu.concatenate %32, %16 in 1 : vector<2x128xf32>, vector<2x128xf32> -> vector<2x256xf32>
    %34 = arith.addf %33, %15 : vector<2x256xf32>
    %35 = vector.extract_strided_slice %11 {offsets = [12, 0], sizes = [2, 128], strides = [1, 1]} : vector<16x128xf32> to vector<2x128xf32>
    %36 = tpu.concatenate %35, %16 in 1 : vector<2x128xf32>, vector<2x128xf32> -> vector<2x256xf32>
    %37 = arith.addf %36, %15 : vector<2x256xf32>
    %38 = vector.extract_strided_slice %11 {offsets = [14, 0], sizes = [2, 128], strides = [1, 1]} : vector<16x128xf32> to vector<2x128xf32>
    %39 = tpu.concatenate %38, %16 in 1 : vector<2x128xf32>, vector<2x128xf32> -> vector<2x256xf32>
    %40 = arith.addf %39, %15 : vector<2x256xf32>
    %41 = tpu.iota {dimensions = array<i32: 1>} : vector<2x256xi32>
    %c128_i32 = arith.constant 128 : i32
    %c0_i32 = arith.constant 0 : i32
    %42 = arith.cmpi eq, %c128_i32, %c0_i32 : i32
    %c1_i32 = arith.constant 1 : i32
    %43 = arith.select %42, %c1_i32, %c128_i32 : i32
    %44 = vector.broadcast %43 : i32 to vector<2x256xi32>
    %45 = arith.remsi %41, %44 : vector<2x256xi32>
    %c0_i32_14 = arith.constant 0 : i32
    %46 = vector.broadcast %c0_i32_14 : i32 to vector<2x256xi32>
    %47 = arith.cmpi ne, %45, %46 : vector<2x256xi32>
    %c0_i32_15 = arith.constant 0 : i32
    %48 = vector.broadcast %c0_i32_15 : i32 to vector<2x256xi32>
    %49 = arith.cmpi slt, %45, %48 : vector<2x256xi32>
    %c0_i32_16 = arith.constant 0 : i32
    %50 = arith.cmpi slt, %43, %c0_i32_16 : i32
    %51 = vector.broadcast %50 : i1 to vector<2x256xi1>
    %52 = vector.broadcast %51 : vector<2x256xi1> to vector<2x256xi1>
    %53 = arith.xori %49, %52 : vector<2x256xi1>
    %54 = arith.andi %53, %47 : vector<2x256xi1>
    %55 = vector.broadcast %43 : i32 to vector<2x256xi32>
    %56 = arith.addi %45, %55 : vector<2x256xi32>
    %57 = arith.select %54, %56, %45 : vector<2x256xi1>, vector<2x256xi32>
    %c64_i32 = arith.constant 64 : i32
    %58 = vector.broadcast %c64_i32 : i32 to vector<2x256xi32>
    %59 = arith.cmpi sge, %57, %58 : vector<2x256xi32>
    %c96_i32 = arith.constant 96 : i32
    %60 = vector.broadcast %c96_i32 : i32 to vector<2x256xi32>
    %61 = arith.cmpi slt, %57, %60 : vector<2x256xi32>
    %62 = arith.andi %59, %61 : vector<2x256xi1>
    %cst_17 = arith.constant 0.000000e+00 : f32
    %63 = vector.broadcast %cst_17 : f32 to vector<2x32xf32>
    %cst_18 = arith.constant 0.000000e+00 : f32
    %64 = vector.broadcast %cst_18 : f32 to vector<2x32xf32>
    %cst_19 = arith.constant 0.000000e+00 : f32
    %65 = vector.broadcast %cst_19 : f32 to vector<2x32xf32>
    %66 = arith.negf %19 : vector<2x256xf32>
    %67 = math.exp %66 : vector<2x256xf32>
    %cst_20 = arith.constant 1.000000e+00 : f32
    %68 = vector.broadcast %cst_20 : f32 to vector<2x256xf32>
    %69 = arith.addf %68, %67 : vector<2x256xf32>
    %70 = arith.divf %68, %69 : vector<2x256xf32>
    %cst_21 = arith.constant 2.000000e+00 : f32
    %71 = vector.broadcast %cst_21 : f32 to vector<2x256xf32>
    %72 = arith.mulf %71, %70 : vector<2x256xf32>
    %cst_22 = arith.constant 1.000000e+00 : f32
    %73 = vector.broadcast %cst_22 : f32 to vector<2x256xf32>
    %74 = arith.subf %72, %73 : vector<2x256xf32>
    %75 = arith.select %62, %74, %70 : vector<2x256xi1>, vector<2x256xf32>
    %76 = vector.extract_strided_slice %75 {offsets = [0, 0], sizes = [2, 128], strides = [1, 1]} : vector<2x256xf32> to vector<2x128xf32>
    %77 = vector.extract_strided_slice %76 {offsets = [0, 0], sizes = [2, 32], strides = [1, 1]} : vector<2x128xf32> to vector<2x32xf32>
    %78 = vector.extract_strided_slice %76 {offsets = [0, 32], sizes = [2, 32], strides = [1, 1]} : vector<2x128xf32> to vector<2x32xf32>
    %79 = vector.extract_strided_slice %76 {offsets = [0, 64], sizes = [2, 32], strides = [1, 1]} : vector<2x128xf32> to vector<2x32xf32>
    %80 = vector.extract_strided_slice %76 {offsets = [0, 96], sizes = [2, 32], strides = [1, 1]} : vector<2x128xf32> to vector<2x32xf32>
    %81 = arith.mulf %78, %64 : vector<2x32xf32>
    %82 = arith.mulf %77, %79 : vector<2x32xf32>
    %83 = arith.addf %81, %82 : vector<2x32xf32>
    %84 = math.tanh %83 : vector<2x32xf32>
    %85 = arith.mulf %80, %84 : vector<2x32xf32>
    %86 = tpu.concatenate %85, %63 in 1 : vector<2x32xf32>, vector<2x32xf32> -> vector<2x64xf32>
    %87 = arith.truncf %86 : vector<2x64xf32> to vector<2x64xbf16>
    %cst_23 = arith.constant dense<0.000000e+00> : vector<2x256xf32>
    %88 = tpu.matmul %87, %12, %cst_23 {dimension_numbers = #tpu.dot_dimension_numbers<[1], [0], [0], [1], [0, 0, 1, 1], [], []>} : vector<2x64xbf16>, vector<64x256xbf16>, vector<2x256xf32> -> vector<2x256xf32>
    %89 = arith.addf %22, %88 : vector<2x256xf32>
    %90 = arith.negf %89 : vector<2x256xf32>
    %91 = math.exp %90 : vector<2x256xf32>
    %cst_24 = arith.constant 1.000000e+00 : f32
    %92 = vector.broadcast %cst_24 : f32 to vector<2x256xf32>
    %93 = arith.addf %92, %91 : vector<2x256xf32>
    %94 = arith.divf %92, %93 : vector<2x256xf32>
    %cst_25 = arith.constant 2.000000e+00 : f32
    %95 = vector.broadcast %cst_25 : f32 to vector<2x256xf32>
    %96 = arith.mulf %95, %94 : vector<2x256xf32>
    %cst_26 = arith.constant 1.000000e+00 : f32
    %97 = vector.broadcast %cst_26 : f32 to vector<2x256xf32>
    %98 = arith.subf %96, %97 : vector<2x256xf32>
    %99 = arith.select %62, %98, %94 : vector<2x256xi1>, vector<2x256xf32>
    %100 = vector.extract_strided_slice %99 {offsets = [0, 0], sizes = [2, 128], strides = [1, 1]} : vector<2x256xf32> to vector<2x128xf32>
    %101 = vector.extract_strided_slice %100 {offsets = [0, 0], sizes = [2, 32], strides = [1, 1]} : vector<2x128xf32> to vector<2x32xf32>
    %102 = vector.extract_strided_slice %100 {offsets = [0, 32], sizes = [2, 32], strides = [1, 1]} : vector<2x128xf32> to vector<2x32xf32>
    %103 = vector.extract_strided_slice %100 {offsets = [0, 64], sizes = [2, 32], strides = [1, 1]} : vector<2x128xf32> to vector<2x32xf32>
    %104 = vector.extract_strided_slice %100 {offsets = [0, 96], sizes = [2, 32], strides = [1, 1]} : vector<2x128xf32> to vector<2x32xf32>
    %105 = arith.mulf %102, %83 : vector<2x32xf32>
    %106 = arith.mulf %101, %103 : vector<2x32xf32>
    %107 = arith.addf %105, %106 : vector<2x32xf32>
    %108 = math.tanh %107 : vector<2x32xf32>
    %109 = arith.mulf %104, %108 : vector<2x32xf32>
    %110 = vector.extract_strided_slice %99 {offsets = [0, 128], sizes = [2, 128], strides = [1, 1]} : vector<2x256xf32> to vector<2x128xf32>
    %111 = vector.extract_strided_slice %110 {offsets = [0, 0], sizes = [2, 32], strides = [1, 1]} : vector<2x128xf32> to vector<2x32xf32>
    %112 = vector.extract_strided_slice %110 {offsets = [0, 32], sizes = [2, 32], strides = [1, 1]} : vector<2x128xf32> to vector<2x32xf32>
    %113 = vector.extract_strided_slice %110 {offsets = [0, 64], sizes = [2, 32], strides = [1, 1]} : vector<2x128xf32> to vector<2x32xf32>
    %114 = vector.extract_strided_slice %110 {offsets = [0, 96], sizes = [2, 32], strides = [1, 1]} : vector<2x128xf32> to vector<2x32xf32>
    %115 = arith.mulf %112, %65 : vector<2x32xf32>
    %116 = arith.mulf %111, %113 : vector<2x32xf32>
    %117 = arith.addf %115, %116 : vector<2x32xf32>
    %118 = math.tanh %117 : vector<2x32xf32>
    %119 = arith.mulf %114, %118 : vector<2x32xf32>
    %120 = tpu.concatenate %109, %119 in 1 : vector<2x32xf32>, vector<2x32xf32> -> vector<2x64xf32>
    %121 = arith.truncf %120 : vector<2x64xf32> to vector<2x64xbf16>
    %cst_27 = arith.constant dense<0.000000e+00> : vector<2x256xf32>
    %122 = tpu.matmul %121, %12, %cst_27 {dimension_numbers = #tpu.dot_dimension_numbers<[1], [0], [0], [1], [0, 0, 1, 1], [], []>} : vector<2x64xbf16>, vector<64x256xbf16>, vector<2x256xf32> -> vector<2x256xf32>
    %123 = arith.addf %25, %122 : vector<2x256xf32>
    %124 = arith.negf %123 : vector<2x256xf32>
    %125 = math.exp %124 : vector<2x256xf32>
    %cst_28 = arith.constant 1.000000e+00 : f32
    %126 = vector.broadcast %cst_28 : f32 to vector<2x256xf32>
    %127 = arith.addf %126, %125 : vector<2x256xf32>
    %128 = arith.divf %126, %127 : vector<2x256xf32>
    %cst_29 = arith.constant 2.000000e+00 : f32
    %129 = vector.broadcast %cst_29 : f32 to vector<2x256xf32>
    %130 = arith.mulf %129, %128 : vector<2x256xf32>
    %cst_30 = arith.constant 1.000000e+00 : f32
    %131 = vector.broadcast %cst_30 : f32 to vector<2x256xf32>
    %132 = arith.subf %130, %131 : vector<2x256xf32>
    %133 = arith.select %62, %132, %128 : vector<2x256xi1>, vector<2x256xf32>
    %134 = vector.extract_strided_slice %133 {offsets = [0, 0], sizes = [2, 128], strides = [1, 1]} : vector<2x256xf32> to vector<2x128xf32>
    %135 = vector.extract_strided_slice %134 {offsets = [0, 0], sizes = [2, 32], strides = [1, 1]} : vector<2x128xf32> to vector<2x32xf32>
    %136 = vector.extract_strided_slice %134 {offsets = [0, 32], sizes = [2, 32], strides = [1, 1]} : vector<2x128xf32> to vector<2x32xf32>
    %137 = vector.extract_strided_slice %134 {offsets = [0, 64], sizes = [2, 32], strides = [1, 1]} : vector<2x128xf32> to vector<2x32xf32>
    %138 = vector.extract_strided_slice %134 {offsets = [0, 96], sizes = [2, 32], strides = [1, 1]} : vector<2x128xf32> to vector<2x32xf32>
    %139 = arith.mulf %136, %107 : vector<2x32xf32>
    %140 = arith.mulf %135, %137 : vector<2x32xf32>
    %141 = arith.addf %139, %140 : vector<2x32xf32>
    %142 = math.tanh %141 : vector<2x32xf32>
    %143 = arith.mulf %138, %142 : vector<2x32xf32>
    %144 = vector.extract_strided_slice %133 {offsets = [0, 128], sizes = [2, 128], strides = [1, 1]} : vector<2x256xf32> to vector<2x128xf32>
    %145 = vector.extract_strided_slice %144 {offsets = [0, 0], sizes = [2, 32], strides = [1, 1]} : vector<2x128xf32> to vector<2x32xf32>
    %146 = vector.extract_strided_slice %144 {offsets = [0, 32], sizes = [2, 32], strides = [1, 1]} : vector<2x128xf32> to vector<2x32xf32>
    %147 = vector.extract_strided_slice %144 {offsets = [0, 64], sizes = [2, 32], strides = [1, 1]} : vector<2x128xf32> to vector<2x32xf32>
    %148 = vector.extract_strided_slice %144 {offsets = [0, 96], sizes = [2, 32], strides = [1, 1]} : vector<2x128xf32> to vector<2x32xf32>
    %149 = arith.mulf %146, %117 : vector<2x32xf32>
    %150 = arith.mulf %145, %147 : vector<2x32xf32>
    %151 = arith.addf %149, %150 : vector<2x32xf32>
    %152 = math.tanh %151 : vector<2x32xf32>
    %153 = arith.mulf %148, %152 : vector<2x32xf32>
    %154 = tpu.concatenate %143, %153 in 1 : vector<2x32xf32>, vector<2x32xf32> -> vector<2x64xf32>
    %155 = arith.truncf %154 : vector<2x64xf32> to vector<2x64xbf16>
    %cst_31 = arith.constant dense<0.000000e+00> : vector<2x256xf32>
    %156 = tpu.matmul %155, %12, %cst_31 {dimension_numbers = #tpu.dot_dimension_numbers<[1], [0], [0], [1], [0, 0, 1, 1], [], []>} : vector<2x64xbf16>, vector<64x256xbf16>, vector<2x256xf32> -> vector<2x256xf32>
    %157 = arith.addf %28, %156 : vector<2x256xf32>
    %158 = arith.negf %157 : vector<2x256xf32>
    %159 = math.exp %158 : vector<2x256xf32>
    %cst_32 = arith.constant 1.000000e+00 : f32
    %160 = vector.broadcast %cst_32 : f32 to vector<2x256xf32>
    %161 = arith.addf %160, %159 : vector<2x256xf32>
    %162 = arith.divf %160, %161 : vector<2x256xf32>
    %cst_33 = arith.constant 2.000000e+00 : f32
    %163 = vector.broadcast %cst_33 : f32 to vector<2x256xf32>
    %164 = arith.mulf %163, %162 : vector<2x256xf32>
    %cst_34 = arith.constant 1.000000e+00 : f32
    %165 = vector.broadcast %cst_34 : f32 to vector<2x256xf32>
    %166 = arith.subf %164, %165 : vector<2x256xf32>
    %167 = arith.select %62, %166, %162 : vector<2x256xi1>, vector<2x256xf32>
    %168 = vector.extract_strided_slice %167 {offsets = [0, 0], sizes = [2, 128], strides = [1, 1]} : vector<2x256xf32> to vector<2x128xf32>
    %169 = vector.extract_strided_slice %168 {offsets = [0, 0], sizes = [2, 32], strides = [1, 1]} : vector<2x128xf32> to vector<2x32xf32>
    %170 = vector.extract_strided_slice %168 {offsets = [0, 32], sizes = [2, 32], strides = [1, 1]} : vector<2x128xf32> to vector<2x32xf32>
    %171 = vector.extract_strided_slice %168 {offsets = [0, 64], sizes = [2, 32], strides = [1, 1]} : vector<2x128xf32> to vector<2x32xf32>
    %172 = vector.extract_strided_slice %168 {offsets = [0, 96], sizes = [2, 32], strides = [1, 1]} : vector<2x128xf32> to vector<2x32xf32>
    %173 = arith.mulf %170, %141 : vector<2x32xf32>
    %174 = arith.mulf %169, %171 : vector<2x32xf32>
    %175 = arith.addf %173, %174 : vector<2x32xf32>
    %176 = math.tanh %175 : vector<2x32xf32>
    %177 = arith.mulf %172, %176 : vector<2x32xf32>
    %178 = vector.extract_strided_slice %167 {offsets = [0, 128], sizes = [2, 128], strides = [1, 1]} : vector<2x256xf32> to vector<2x128xf32>
    %179 = vector.extract_strided_slice %178 {offsets = [0, 0], sizes = [2, 32], strides = [1, 1]} : vector<2x128xf32> to vector<2x32xf32>
    %180 = vector.extract_strided_slice %178 {offsets = [0, 32], sizes = [2, 32], strides = [1, 1]} : vector<2x128xf32> to vector<2x32xf32>
    %181 = vector.extract_strided_slice %178 {offsets = [0, 64], sizes = [2, 32], strides = [1, 1]} : vector<2x128xf32> to vector<2x32xf32>
    %182 = vector.extract_strided_slice %178 {offsets = [0, 96], sizes = [2, 32], strides = [1, 1]} : vector<2x128xf32> to vector<2x32xf32>
    %183 = arith.mulf %180, %151 : vector<2x32xf32>
    %184 = arith.mulf %179, %181 : vector<2x32xf32>
    %185 = arith.addf %183, %184 : vector<2x32xf32>
    %186 = math.tanh %185 : vector<2x32xf32>
    %187 = arith.mulf %182, %186 : vector<2x32xf32>
    %188 = tpu.concatenate %177, %187 in 1 : vector<2x32xf32>, vector<2x32xf32> -> vector<2x64xf32>
    %189 = arith.truncf %188 : vector<2x64xf32> to vector<2x64xbf16>
    %cst_35 = arith.constant dense<0.000000e+00> : vector<2x256xf32>
    %190 = tpu.matmul %189, %12, %cst_35 {dimension_numbers = #tpu.dot_dimension_numbers<[1], [0], [0], [1], [0, 0, 1, 1], [], []>} : vector<2x64xbf16>, vector<64x256xbf16>, vector<2x256xf32> -> vector<2x256xf32>
    %191 = arith.addf %31, %190 : vector<2x256xf32>
    %192 = arith.negf %191 : vector<2x256xf32>
    %193 = math.exp %192 : vector<2x256xf32>
    %cst_36 = arith.constant 1.000000e+00 : f32
    %194 = vector.broadcast %cst_36 : f32 to vector<2x256xf32>
    %195 = arith.addf %194, %193 : vector<2x256xf32>
    %196 = arith.divf %194, %195 : vector<2x256xf32>
    %cst_37 = arith.constant 2.000000e+00 : f32
    %197 = vector.broadcast %cst_37 : f32 to vector<2x256xf32>
    %198 = arith.mulf %197, %196 : vector<2x256xf32>
    %cst_38 = arith.constant 1.000000e+00 : f32
    %199 = vector.broadcast %cst_38 : f32 to vector<2x256xf32>
    %200 = arith.subf %198, %199 : vector<2x256xf32>
    %201 = arith.select %62, %200, %196 : vector<2x256xi1>, vector<2x256xf32>
    %202 = vector.extract_strided_slice %201 {offsets = [0, 0], sizes = [2, 128], strides = [1, 1]} : vector<2x256xf32> to vector<2x128xf32>
    %203 = vector.extract_strided_slice %202 {offsets = [0, 0], sizes = [2, 32], strides = [1, 1]} : vector<2x128xf32> to vector<2x32xf32>
    %204 = vector.extract_strided_slice %202 {offsets = [0, 32], sizes = [2, 32], strides = [1, 1]} : vector<2x128xf32> to vector<2x32xf32>
    %205 = vector.extract_strided_slice %202 {offsets = [0, 64], sizes = [2, 32], strides = [1, 1]} : vector<2x128xf32> to vector<2x32xf32>
    %206 = vector.extract_strided_slice %202 {offsets = [0, 96], sizes = [2, 32], strides = [1, 1]} : vector<2x128xf32> to vector<2x32xf32>
    %207 = arith.mulf %204, %175 : vector<2x32xf32>
    %208 = arith.mulf %203, %205 : vector<2x32xf32>
    %209 = arith.addf %207, %208 : vector<2x32xf32>
    %210 = math.tanh %209 : vector<2x32xf32>
    %211 = arith.mulf %206, %210 : vector<2x32xf32>
    %212 = vector.extract_strided_slice %201 {offsets = [0, 128], sizes = [2, 128], strides = [1, 1]} : vector<2x256xf32> to vector<2x128xf32>
    %213 = vector.extract_strided_slice %212 {offsets = [0, 0], sizes = [2, 32], strides = [1, 1]} : vector<2x128xf32> to vector<2x32xf32>
    %214 = vector.extract_strided_slice %212 {offsets = [0, 32], sizes = [2, 32], strides = [1, 1]} : vector<2x128xf32> to vector<2x32xf32>
    %215 = vector.extract_strided_slice %212 {offsets = [0, 64], sizes = [2, 32], strides = [1, 1]} : vector<2x128xf32> to vector<2x32xf32>
    %216 = vector.extract_strided_slice %212 {offsets = [0, 96], sizes = [2, 32], strides = [1, 1]} : vector<2x128xf32> to vector<2x32xf32>
    %217 = arith.mulf %214, %185 : vector<2x32xf32>
    %218 = arith.mulf %213, %215 : vector<2x32xf32>
    %219 = arith.addf %217, %218 : vector<2x32xf32>
    %220 = math.tanh %219 : vector<2x32xf32>
    %221 = arith.mulf %216, %220 : vector<2x32xf32>
    %222 = tpu.concatenate %211, %221 in 1 : vector<2x32xf32>, vector<2x32xf32> -> vector<2x64xf32>
    %223 = arith.truncf %222 : vector<2x64xf32> to vector<2x64xbf16>
    %cst_39 = arith.constant dense<0.000000e+00> : vector<2x256xf32>
    %224 = tpu.matmul %223, %12, %cst_39 {dimension_numbers = #tpu.dot_dimension_numbers<[1], [0], [0], [1], [0, 0, 1, 1], [], []>} : vector<2x64xbf16>, vector<64x256xbf16>, vector<2x256xf32> -> vector<2x256xf32>
    %225 = arith.addf %34, %224 : vector<2x256xf32>
    %226 = arith.negf %225 : vector<2x256xf32>
    %227 = math.exp %226 : vector<2x256xf32>
    %cst_40 = arith.constant 1.000000e+00 : f32
    %228 = vector.broadcast %cst_40 : f32 to vector<2x256xf32>
    %229 = arith.addf %228, %227 : vector<2x256xf32>
    %230 = arith.divf %228, %229 : vector<2x256xf32>
    %cst_41 = arith.constant 2.000000e+00 : f32
    %231 = vector.broadcast %cst_41 : f32 to vector<2x256xf32>
    %232 = arith.mulf %231, %230 : vector<2x256xf32>
    %cst_42 = arith.constant 1.000000e+00 : f32
    %233 = vector.broadcast %cst_42 : f32 to vector<2x256xf32>
    %234 = arith.subf %232, %233 : vector<2x256xf32>
    %235 = arith.select %62, %234, %230 : vector<2x256xi1>, vector<2x256xf32>
    %236 = vector.extract_strided_slice %235 {offsets = [0, 0], sizes = [2, 128], strides = [1, 1]} : vector<2x256xf32> to vector<2x128xf32>
    %237 = vector.extract_strided_slice %236 {offsets = [0, 0], sizes = [2, 32], strides = [1, 1]} : vector<2x128xf32> to vector<2x32xf32>
    %238 = vector.extract_strided_slice %236 {offsets = [0, 32], sizes = [2, 32], strides = [1, 1]} : vector<2x128xf32> to vector<2x32xf32>
    %239 = vector.extract_strided_slice %236 {offsets = [0, 64], sizes = [2, 32], strides = [1, 1]} : vector<2x128xf32> to vector<2x32xf32>
    %240 = vector.extract_strided_slice %236 {offsets = [0, 96], sizes = [2, 32], strides = [1, 1]} : vector<2x128xf32> to vector<2x32xf32>
    %241 = arith.mulf %238, %209 : vector<2x32xf32>
    %242 = arith.mulf %237, %239 : vector<2x32xf32>
    %243 = arith.addf %241, %242 : vector<2x32xf32>
    %244 = math.tanh %243 : vector<2x32xf32>
    %245 = arith.mulf %240, %244 : vector<2x32xf32>
    %246 = vector.extract_strided_slice %235 {offsets = [0, 128], sizes = [2, 128], strides = [1, 1]} : vector<2x256xf32> to vector<2x128xf32>
    %247 = vector.extract_strided_slice %246 {offsets = [0, 0], sizes = [2, 32], strides = [1, 1]} : vector<2x128xf32> to vector<2x32xf32>
    %248 = vector.extract_strided_slice %246 {offsets = [0, 32], sizes = [2, 32], strides = [1, 1]} : vector<2x128xf32> to vector<2x32xf32>
    %249 = vector.extract_strided_slice %246 {offsets = [0, 64], sizes = [2, 32], strides = [1, 1]} : vector<2x128xf32> to vector<2x32xf32>
    %250 = vector.extract_strided_slice %246 {offsets = [0, 96], sizes = [2, 32], strides = [1, 1]} : vector<2x128xf32> to vector<2x32xf32>
    %251 = arith.mulf %248, %219 : vector<2x32xf32>
    %252 = arith.mulf %247, %249 : vector<2x32xf32>
    %253 = arith.addf %251, %252 : vector<2x32xf32>
    %254 = math.tanh %253 : vector<2x32xf32>
    %255 = arith.mulf %250, %254 : vector<2x32xf32>
    %256 = tpu.concatenate %245, %255 in 1 : vector<2x32xf32>, vector<2x32xf32> -> vector<2x64xf32>
    %257 = arith.truncf %256 : vector<2x64xf32> to vector<2x64xbf16>
    %cst_43 = arith.constant dense<0.000000e+00> : vector<2x256xf32>
    %258 = tpu.matmul %257, %12, %cst_43 {dimension_numbers = #tpu.dot_dimension_numbers<[1], [0], [0], [1], [0, 0, 1, 1], [], []>} : vector<2x64xbf16>, vector<64x256xbf16>, vector<2x256xf32> -> vector<2x256xf32>
    %259 = arith.addf %37, %258 : vector<2x256xf32>
    %260 = arith.negf %259 : vector<2x256xf32>
    %261 = math.exp %260 : vector<2x256xf32>
    %cst_44 = arith.constant 1.000000e+00 : f32
    %262 = vector.broadcast %cst_44 : f32 to vector<2x256xf32>
    %263 = arith.addf %262, %261 : vector<2x256xf32>
    %264 = arith.divf %262, %263 : vector<2x256xf32>
    %cst_45 = arith.constant 2.000000e+00 : f32
    %265 = vector.broadcast %cst_45 : f32 to vector<2x256xf32>
    %266 = arith.mulf %265, %264 : vector<2x256xf32>
    %cst_46 = arith.constant 1.000000e+00 : f32
    %267 = vector.broadcast %cst_46 : f32 to vector<2x256xf32>
    %268 = arith.subf %266, %267 : vector<2x256xf32>
    %269 = arith.select %62, %268, %264 : vector<2x256xi1>, vector<2x256xf32>
    %270 = vector.extract_strided_slice %269 {offsets = [0, 0], sizes = [2, 128], strides = [1, 1]} : vector<2x256xf32> to vector<2x128xf32>
    %271 = vector.extract_strided_slice %270 {offsets = [0, 0], sizes = [2, 32], strides = [1, 1]} : vector<2x128xf32> to vector<2x32xf32>
    %272 = vector.extract_strided_slice %270 {offsets = [0, 32], sizes = [2, 32], strides = [1, 1]} : vector<2x128xf32> to vector<2x32xf32>
    %273 = vector.extract_strided_slice %270 {offsets = [0, 64], sizes = [2, 32], strides = [1, 1]} : vector<2x128xf32> to vector<2x32xf32>
    %274 = vector.extract_strided_slice %270 {offsets = [0, 96], sizes = [2, 32], strides = [1, 1]} : vector<2x128xf32> to vector<2x32xf32>
    %275 = arith.mulf %272, %243 : vector<2x32xf32>
    %276 = arith.mulf %271, %273 : vector<2x32xf32>
    %277 = arith.addf %275, %276 : vector<2x32xf32>
    %278 = math.tanh %277 : vector<2x32xf32>
    %279 = arith.mulf %274, %278 : vector<2x32xf32>
    %280 = vector.extract_strided_slice %269 {offsets = [0, 128], sizes = [2, 128], strides = [1, 1]} : vector<2x256xf32> to vector<2x128xf32>
    %281 = vector.extract_strided_slice %280 {offsets = [0, 0], sizes = [2, 32], strides = [1, 1]} : vector<2x128xf32> to vector<2x32xf32>
    %282 = vector.extract_strided_slice %280 {offsets = [0, 32], sizes = [2, 32], strides = [1, 1]} : vector<2x128xf32> to vector<2x32xf32>
    %283 = vector.extract_strided_slice %280 {offsets = [0, 64], sizes = [2, 32], strides = [1, 1]} : vector<2x128xf32> to vector<2x32xf32>
    %284 = vector.extract_strided_slice %280 {offsets = [0, 96], sizes = [2, 32], strides = [1, 1]} : vector<2x128xf32> to vector<2x32xf32>
    %285 = arith.mulf %282, %253 : vector<2x32xf32>
    %286 = arith.mulf %281, %283 : vector<2x32xf32>
    %287 = arith.addf %285, %286 : vector<2x32xf32>
    %288 = math.tanh %287 : vector<2x32xf32>
    %289 = arith.mulf %284, %288 : vector<2x32xf32>
    %290 = tpu.concatenate %279, %289 in 1 : vector<2x32xf32>, vector<2x32xf32> -> vector<2x64xf32>
    %291 = arith.truncf %290 : vector<2x64xf32> to vector<2x64xbf16>
    %cst_47 = arith.constant dense<0.000000e+00> : vector<2x256xf32>
    %292 = tpu.matmul %291, %12, %cst_47 {dimension_numbers = #tpu.dot_dimension_numbers<[1], [0], [0], [1], [0, 0, 1, 1], [], []>} : vector<2x64xbf16>, vector<64x256xbf16>, vector<2x256xf32> -> vector<2x256xf32>
    %293 = arith.addf %40, %292 : vector<2x256xf32>
    %294 = arith.negf %293 : vector<2x256xf32>
    %295 = math.exp %294 : vector<2x256xf32>
    %cst_48 = arith.constant 1.000000e+00 : f32
    %296 = vector.broadcast %cst_48 : f32 to vector<2x256xf32>
    %297 = arith.addf %296, %295 : vector<2x256xf32>
    %298 = arith.divf %296, %297 : vector<2x256xf32>
    %cst_49 = arith.constant 2.000000e+00 : f32
    %299 = vector.broadcast %cst_49 : f32 to vector<2x256xf32>
    %300 = arith.mulf %299, %298 : vector<2x256xf32>
    %cst_50 = arith.constant 1.000000e+00 : f32
    %301 = vector.broadcast %cst_50 : f32 to vector<2x256xf32>
    %302 = arith.subf %300, %301 : vector<2x256xf32>
    %303 = arith.select %62, %302, %298 : vector<2x256xi1>, vector<2x256xf32>
    %304 = vector.extract_strided_slice %303 {offsets = [0, 0], sizes = [2, 128], strides = [1, 1]} : vector<2x256xf32> to vector<2x128xf32>
    %305 = vector.extract_strided_slice %304 {offsets = [0, 0], sizes = [2, 32], strides = [1, 1]} : vector<2x128xf32> to vector<2x32xf32>
    %306 = vector.extract_strided_slice %304 {offsets = [0, 32], sizes = [2, 32], strides = [1, 1]} : vector<2x128xf32> to vector<2x32xf32>
    %307 = vector.extract_strided_slice %304 {offsets = [0, 64], sizes = [2, 32], strides = [1, 1]} : vector<2x128xf32> to vector<2x32xf32>
    %308 = vector.extract_strided_slice %304 {offsets = [0, 96], sizes = [2, 32], strides = [1, 1]} : vector<2x128xf32> to vector<2x32xf32>
    %309 = arith.mulf %306, %277 : vector<2x32xf32>
    %310 = arith.mulf %305, %307 : vector<2x32xf32>
    %311 = arith.addf %309, %310 : vector<2x32xf32>
    %312 = math.tanh %311 : vector<2x32xf32>
    %313 = arith.mulf %308, %312 : vector<2x32xf32>
    %314 = vector.extract_strided_slice %303 {offsets = [0, 128], sizes = [2, 128], strides = [1, 1]} : vector<2x256xf32> to vector<2x128xf32>
    %315 = vector.extract_strided_slice %314 {offsets = [0, 0], sizes = [2, 32], strides = [1, 1]} : vector<2x128xf32> to vector<2x32xf32>
    %316 = vector.extract_strided_slice %314 {offsets = [0, 32], sizes = [2, 32], strides = [1, 1]} : vector<2x128xf32> to vector<2x32xf32>
    %317 = vector.extract_strided_slice %314 {offsets = [0, 64], sizes = [2, 32], strides = [1, 1]} : vector<2x128xf32> to vector<2x32xf32>
    %318 = vector.extract_strided_slice %314 {offsets = [0, 96], sizes = [2, 32], strides = [1, 1]} : vector<2x128xf32> to vector<2x32xf32>
    %319 = arith.mulf %316, %287 : vector<2x32xf32>
    %320 = arith.mulf %315, %317 : vector<2x32xf32>
    %321 = arith.addf %319, %320 : vector<2x32xf32>
    %322 = math.tanh %321 : vector<2x32xf32>
    %323 = arith.mulf %318, %322 : vector<2x32xf32>
    %324 = tpu.concatenate %313, %323 in 1 : vector<2x32xf32>, vector<2x32xf32> -> vector<2x64xf32>
    %325 = arith.truncf %324 : vector<2x64xf32> to vector<2x64xbf16>
    %cst_51 = arith.constant dense<0.000000e+00> : vector<2x256xf32>
    %326 = tpu.matmul %325, %12, %cst_51 {dimension_numbers = #tpu.dot_dimension_numbers<[1], [0], [0], [1], [0, 0, 1, 1], [], []>} : vector<2x64xbf16>, vector<64x256xbf16>, vector<2x256xf32> -> vector<2x256xf32>
    %327 = arith.addf %15, %326 : vector<2x256xf32>
    %328 = arith.negf %327 : vector<2x256xf32>
    %329 = math.exp %328 : vector<2x256xf32>
    %cst_52 = arith.constant 1.000000e+00 : f32
    %330 = vector.broadcast %cst_52 : f32 to vector<2x256xf32>
    %331 = arith.addf %330, %329 : vector<2x256xf32>
    %332 = arith.divf %330, %331 : vector<2x256xf32>
    %cst_53 = arith.constant 2.000000e+00 : f32
    %333 = vector.broadcast %cst_53 : f32 to vector<2x256xf32>
    %334 = arith.mulf %333, %332 : vector<2x256xf32>
    %cst_54 = arith.constant 1.000000e+00 : f32
    %335 = vector.broadcast %cst_54 : f32 to vector<2x256xf32>
    %336 = arith.subf %334, %335 : vector<2x256xf32>
    %337 = arith.select %62, %336, %332 : vector<2x256xi1>, vector<2x256xf32>
    %338 = vector.extract_strided_slice %337 {offsets = [0, 128], sizes = [2, 128], strides = [1, 1]} : vector<2x256xf32> to vector<2x128xf32>
    %339 = vector.extract_strided_slice %338 {offsets = [0, 0], sizes = [2, 32], strides = [1, 1]} : vector<2x128xf32> to vector<2x32xf32>
    %340 = vector.extract_strided_slice %338 {offsets = [0, 32], sizes = [2, 32], strides = [1, 1]} : vector<2x128xf32> to vector<2x32xf32>
    %341 = vector.extract_strided_slice %338 {offsets = [0, 64], sizes = [2, 32], strides = [1, 1]} : vector<2x128xf32> to vector<2x32xf32>
    %342 = vector.extract_strided_slice %338 {offsets = [0, 96], sizes = [2, 32], strides = [1, 1]} : vector<2x128xf32> to vector<2x32xf32>
    %343 = arith.mulf %340, %321 : vector<2x32xf32>
    %344 = arith.mulf %339, %341 : vector<2x32xf32>
    %345 = arith.addf %343, %344 : vector<2x32xf32>
    %346 = math.tanh %345 : vector<2x32xf32>
    %347 = arith.mulf %342, %346 : vector<2x32xf32>
    %348 = arith.truncf %347 : vector<2x32xf32> to vector<2x32xbf16>
    %c0_55 = arith.constant 0 : index
    %c0_56 = arith.constant 0 : index
    %349 = vector.load %arg6[%c0_55, %c0_56] : memref<32x4xbf16, #tpu.memory_space<vmem>>, vector<32x4xbf16>
    %cst_57 = arith.constant dense<0.000000e+00> : vector<2x4xf32>
    %350 = tpu.matmul %348, %349, %cst_57 {dimension_numbers = #tpu.dot_dimension_numbers<[1], [0], [0], [1], [0, 0, 1, 1], [], []>} : vector<2x32xbf16>, vector<32x4xbf16>, vector<2x4xf32> -> vector<2x4xf32>
    %c0_58 = arith.constant 0 : index
    %c0_59 = arith.constant 0 : index
    %351 = vector.load %arg7[%c0_58, %c0_59] : memref<1x4xf32, #tpu.memory_space<vmem>>, vector<1x4xf32>
    %352 = vector.broadcast %351 : vector<1x4xf32> to vector<2x4xf32>
    %353 = arith.addf %350, %352 : vector<2x4xf32>
    %c0_60 = arith.constant 0 : index
    %c0_61 = arith.constant 0 : index
    %354 = vector.load %arg8[%c0_60, %c0_61] : memref<2x4xf32, #tpu.memory_space<vmem>>, vector<2x4xf32>
    tpu.vector_store %arg8[%c0_60, %c0_61], %353 {strides = array<i32>} : memref<2x4xf32, #tpu.memory_space<vmem>>, vector<2x4xf32>,
    return
  }
}

</mosaic_0001>

<bundles_post_ra>
// kernel: tpu_custom_call.1
= control target key start
LH: loop header
LB: loop body
LE: loop exit
PB: predicated region body
PF: predicated region fallthrough
CT: control target
= control target key end

     0   :  { %13 = vsyncpa [#allocation3], 0  ;;  %s2096_s0 = inlined_call_operand.vmem [shape: f32[16,16], index: 0, kind: input, shape index: {}]   ;;  %s2097_s1 = inlined_call_operand.hbm [shape: bf16[16,64], index: 1, kind: input, shape index: {}]   ;;  %s2098_s2 = inlined_call_operand.vmem [shape: f32[1,64], index: 2, kind: input, shape index: {}]   ;;  %s2099_s3 = inlined_call_operand.hbm [shape: bf16[64,128], index: 3, kind: input, shape index: {}]   ;;  %s2100_s4 = inlined_call_operand.hbm [shape: bf16[64,256], index: 4, kind: input, shape index: {}]   ;;  %s2101_s5 = inlined_call_operand.vmem [shape: f32[1,256], index: 5, kind: input, shape index: {}]   ;;  %s2102_s6 = inlined_call_operand.vmem [shape: bf16[32,4], index: 6, kind: input, shape index: {}]   ;;  %s2103_s7 = inlined_call_operand.vmem [shape: f32[1,4], index: 7, kind: input, shape index: {}]   ;;  %s2104_s8 = inlined_call_operand.hbm [shape: f32[2,4], index: 8, kind: output, shape index: {}]  }
   0x1   :  { %14 = vsyncpa [#allocation6], 0 }
   0x2   :  { %15 = vsyncpa [#allocation4], 0  ;;  %s1665_s27 = smov [#allocation5]   ;;  %s1666_s29 = smov [#allocation2]  }
   0x3   :  { %s37_s28 = sshll.u32 %s1665_s27, 4  ;;  %s23_s30 = sshll.u32 %s1666_s29, 4  ;;  %s38_s28 = int_to_ptr.vmem [resolvable:$true] %s37_s28  ;;  %s1722_s30 = int_to_ptr.vmem [resolvable:$true] %s23_s30 }
   0x4   :  { %s1571_s11 = scalar_lea.hbm %s2099_s3, 512 }
   0x5   :  { %p1572_p0 = scmp.ne.s32.totalorder %s2099_s3, %s1571_s11  ;;  %p1575_p1 = scmp.lt.u32.totalorder %s1571_s11, %s2099_s3 }
   0x7   :  { %p1577_p2 = pnand %p1575_p1, %p1572_p0 }
   0x9   :  { %1580 = shalt.err (!%p1577_p2)
}
   0xa   :  { %s1581_s16 = scalar_lea.vmem %s38_s28, 512  ;;  %p1586_p4 = scmp.lt.s32.totalorder %s38_s28, %s38_s28 }
   0xb   :  { %p1582_p3 = scmp.ne.s32.totalorder %s38_s28, %s1581_s16  ;;  %p1587_p5 = scmp.lt.s32.totalorder %s1581_s16, %s1581_s16 }
   0xd   :  { %p1588_p6 = por %p1587_p5, %p1586_p4 }
   0xf   :  { %p1589_p7 = pnand %p1588_p6, %p1582_p3 }
  0x11   :  { %1592 = shalt.err (!%p1589_p7)
}
  0x12   :  { %s1667_s17 = smov 64   ;;  %s1668_s18 = smov 4  }
  0x13   :  { %43 = dma.hbm_to_vmem [thread:$0]  %s2099_s3, 512, %s38_s28, [#allocation6], %s1667_s17, %s1667_s17, %s1668_s18  }
  0x14   :  { %s1593_s23 = scalar_lea.hbm %s2097_s1, 128 }
  0x15   :  { %p1594_p8 = scmp.ne.s32.totalorder %s2097_s1, %s1593_s23  ;;  %p1597_p9 = scmp.lt.u32.totalorder %s1593_s23, %s2097_s1 }
  0x17   :  { %p1599_p10 = pnand %p1597_p9, %p1594_p8 }
  0x19   :  { %1602 = shalt.err (!%p1599_p10)
}
  0x1a   :  { %s1603_s29 = scalar_lea.vmem %s1722_s30, 128  ;;  %p1608_p12 = scmp.lt.s32.totalorder %s1722_s30, %s1722_s30 }
  0x1b   :  { %p1604_p11 = scmp.ne.s32.totalorder %s1722_s30, %s1603_s29  ;;  %p1609_p13 = scmp.lt.s32.totalorder %s1603_s29, %s1603_s29 }
  0x1d   :  { %p1610_p0 = por %p1609_p13, %p1608_p12 }
  0x1f   :  { %p1611_p1 = pnand %p1610_p0, %p1604_p11 }
  0x21   :  { %1614 = shalt.err (!%p1611_p1)
}
  0x22   :  { %29 = dma.hbm_to_vmem [thread:$0]  %s2097_s1, 128, %s1722_s30, [#allocation3], %s1667_s17, %s1667_s17, %s1668_s18  }
  0x23   :  { %s1669_s9 = smov [#allocation7]   ;;  %s1615_s13 = scalar_lea.hbm %s2100_s4, 1024 }
  0x24   :  { %s49_s10 = sshll.u32 %s1669_s9, 4  ;;  %p1616_p2 = scmp.ne.s32.totalorder %s2100_s4, %s1615_s13  ;;  %s50_s10 = int_to_ptr.vmem [resolvable:$true] %s49_s10 }
  0x25   :  { %p1619_p3 = scmp.lt.u32.totalorder %s1615_s13, %s2100_s4 }
  0x27   :  { %p1621_p4 = pnand %p1619_p3, %p1616_p2 }
  0x29   :  { %1624 = shalt.err (!%p1621_p4)
}
  0x2a   :  { %s1625_s20 = scalar_lea.vmem %s50_s10, 1024  ;;  %p1630_p6 = scmp.lt.s32.totalorder %s50_s10, %s50_s10 }
  0x2b   :  { %p1626_p5 = scmp.ne.s32.totalorder %s50_s10, %s1625_s20  ;;  %p1631_p7 = scmp.lt.s32.totalorder %s1625_s20, %s1625_s20 }
  0x2d   :  { %p1632_p8 = por %p1631_p7, %p1630_p6 }
  0x2f   :  { %p1633_p9 = pnand %p1632_p8, %p1626_p5 }
  0x31   :  { %1636 = shalt.err (!%p1633_p9)
}
  0x32   :  { %s1670_s1 = smov 128   ;;  %s1671_s30 = smov 8  }
  0x33   :  { %55 = dma.hbm_to_vmem [thread:$0]  %s2100_s4, 1024, %s50_s10, [#allocation6], %s1670_s1, %s1670_s1, %s1671_s30  }
  0x34   :  { %1659 = dma.done.wait [#allocation3], 128  }
  0x35   :  { %1660 = vsyncadd [#allocation3], 4294967168 }
  0x36   :  { %1661 = dma.done.wait [#allocation6], 1536  }
  0x37   :  { %1662 = vsyncadd [#allocation6], 4294965760  ;;  %v1672_v0 = vmov 0.0   ;;  %vm1673_vm0 = vmmov 0   ;;  %v1456_v1 = vld [vmem:[#allocation2] sm:$0xff]   ;;  %v73_v3 = vld [vmem:[%s2096_s0 + $0x8] sm:$0xff]  ;;  %v225_v19 = vlaneseq }
  0x38   :  { %1418 = vmatprep.subr.bf16.mxu0 %v1672_v0  ;;  %1420 = vmatprep.mubr.msk.bf16.mxu0 %vm1673_vm0, %v1672_v0  ;;  %v72_v2 = vld [vmem:[%s2096_s0] sm:$0xff]  ;;  %vm90_vm1 = vcmask 130048   ;;  %v1457_v5 = vld [vmem:[#allocation5] sm:$0xff]   ;;  %v1458_v6 = vld [vmem:[#allocation5 + $0x8] sm:$0xff]   ;;  %vm170_vm2 = vcmask 523264   ;;  %v1675_v55 = vmov 0  }
  0x39   :  { %1424 = vmatprep.subr.bf16.mxu1 %v1672_v0  ;;  %1432 = vmatprep.mubr.msk.bf16.mxu1 %vm1673_vm0, %v1672_v0  ;;  %v74_v4 = vpack.c.bf16 %v73_v3, %v72_v2  ;;  %v1459_v7 = vld [vmem:[#allocation5 + $0x10] sm:$0xff]   ;;  %v1460_v8 = vld [vmem:[#allocation5 + $0x18] sm:$0xff]   ;;  %v226_v20 = vshrl.u32 %v225_v19, 7  ;;  %v1798_v35 = vand.u32 127, %v225_v19  ;;  %v1813_v46 = vld [vmem:[#allocation7 + $0x4] ss:$8 sps:$4 sm:$0xff]  }
  0x3a   :  { %1419 = vmatpush3.bf16.msra.mxu0 %v1456_v1  ;;  %1425 = vmatpush3.bf16.msra.mxu1 %v1457_v5  ;;  %v1348_v9 = vld [vmem:[%s2098_s2] ss:$0 sm:$0xff]  ;;  %s1674_s2 = smov 32   ;;  %v1815_v47 = vld [vmem:[#allocation7] ss:$8 sps:$4 sm:$0xff]   ;;  %vm301_vm6 = vcmask 261120  }
  0x3b   :  { %1426 = vmatprep.subr.bf16.mxu1 %v1672_v0  ;;  %v231_v21 = vsub.s32 1, %v226_v20  ;;  %v223_v22 = vld [vmem:[%s2101_s5] sm:$0x3]  ;;  %v227_v24 = vsub.s32 0, %v226_v20  ;;  %vm265_vm3 = vcmp.ge.s32.totalorder %v1798_v35, 64  ;;  %vm267_vm4 = vcmp.lt.s32.totalorder %v1798_v35, 96  ;;  %347 = vmatprep.subr.bf16.mxu0 %v1813_v46 }
  0x3c   :  { %vm1802_vm5 = vmand %vm265_vm3, %vm267_vm4  ;;  %v1817_v48 = vld [vmem:[#allocation7 + $0x14] ss:$8 sps:$4 sm:$0xff]   ;;  %v1822_v49 = vld [vmem:[#allocation7 + $0x10] ss:$8 sps:$4 sm:$0xff]   ;;  %s1676_s11 = smov [#allocation8]   ;;  %vm1330_vm10 = vcmask 25600  }
  0x3d   :  { %1421 = vmatmul.mubr.msk.bf16.vlgmr.msra.gmra.mrb[0].mxu0 %vm90_vm1, %v74_v4  ;;  %v1791_v23 = vrot.slane %v223_v22, %v231_v21  ;;  %v228_v25 = vrot.slane %v223_v22, %v227_v24  ;;  %v1826_v50 = vld [vmem:[#allocation7 + $0x24] ss:$8 sps:$4 sm:$0xff]   ;;  %v1830_v51 = vld [vmem:[#allocation7 + $0x20] ss:$8 sps:$4 sm:$0xff]   ;;  %v1834_v52 = vld [vmem:[#allocation7 + $0x34] ss:$8 sps:$4 sm:$0xff]  }
  0x3e   :  { %1427 = vmatpush3.bf16.msra.mxu1 %v1458_v6  ;;  %348 = vmatpush1.bf16.msra.mxu0 %v1815_v47  ;;  %v1842_v54 = vld [vmem:[#allocation7 + $0x30] ss:$8 sps:$4 sm:$0xff]  }
  0x3f   :  { %1428 = vmatprep.subr.bf16.mxu1 %v1672_v0  ;;  %349 = vmatprep.subr.bf16.mxu0 %v1817_v48 }
  0x40   :  { %379 = vmatprep.mubr.bf16.mxu0 %v1675_v55 }
  0x42   :  { %1429 = vmatpush3.bf16.msra.mxu1 %v1459_v7  ;;  %350 = vmatpush1.bf16.msra.mxu0 %v1822_v49 }
  0x43   :  { %1430 = vmatprep.subr.bf16.mxu1 %v1672_v0  ;;  %351 = vmatprep.subr.bf16.mxu0 %v1826_v50 }
  0x46   :  { %1431 = vmatpush3.bf16.msra.mxu1 %v1460_v8  ;;  %352 = vmatpush1.bf16.msra.mxu0 %v1830_v51 }
  0x47   :  { %466 = vmatprep.subr.bf16.mxu1 %v1813_v46  ;;  %353 = vmatprep.subr.bf16.mxu0 %v1834_v52 }
  0x4a   :  { %354 = vmatpush1.bf16.msra.mxu0 %v1842_v54 }
  0x4b   :  { %588 = vmatprep.subr.bf16.mxu0 %v1813_v46 }
 0x110   :  { %v128_v10 = vpop.f32.mrb[0].mxu0 }
 0x111   :  { %v129_v11 = vadd.f32 %v1348_v9, %v128_v10  ;;  %v1422_v12 = vpop.f32.mrb[1].mxu0 }
 0x112   :  { %v131_v13 = vpop.f32.mrb[2].mxu0  ;;  %v240_v12 = vadd.s32 128, %v1798_v35 }
 0x113   :  { %v132_v14 = vadd.f32 %v1348_v9, %v131_v13  ;;  %v1423_v15 = vpop.f32.mrb[3].mxu0  ;;  %v135_v16 = vmax.f32 %v129_v11, 0.0 }
 0x114   :  { %v252_v13 = vand.u32 127, %v240_v12 }
 0x115   :  { %v136_v17 = vmax.f32 %v132_v14, 0.0 }
 0x116   :  { %vm266_vm7 = vcmp.ge.s32.totalorder %v252_v13, 64  ;;  %vm268_vm8 = vcmp.lt.s32.totalorder %v252_v13, 96 }
 0x117   :  { %v137_v18 = vpack.c.bf16 %v136_v17, %v135_v16  ;;  %vm1865_vm9 = vmand %vm266_vm7, %vm268_vm8 }
 0x119   :  { %1433 = vmatmul.mubr.msk.bf16.vlgmr.msra.gmra.mrb[0].mxu1 %vm170_vm2, %v137_v18  ;;  %v1474_v18 = vld [vmem:[%s2102_s6 + $0x8] sm:$0xff]  }
 0x11a   :  { %467 = vmatpush1.bf16.msra.mxu1 %v1815_v47  ;;  %498 = vmatprep.mubr.bf16.mxu1 %v1675_v55 }
 0x11b   :  { %468 = vmatprep.subr.bf16.mxu1 %v1817_v48 }
 0x11e   :  { %469 = vmatpush1.bf16.msra.mxu1 %v1822_v49 }
 0x11f   :  { %470 = vmatprep.subr.bf16.mxu1 %v1826_v50 }
 0x122   :  { %471 = vmatpush1.bf16.msra.mxu1 %v1830_v51 }
 0x123   :  { %472 = vmatprep.subr.bf16.mxu1 %v1834_v52 }
 0x126   :  { %473 = vmatpush1.bf16.msra.mxu1 %v1842_v54 }
 0x127   :  { %710 = vmatprep.subr.bf16.mxu1 %v1813_v46 }
 0x1ec   :  { %v208_v26 = vpop.f32.mrb[0].mxu1 }
 0x1ed   :  { %v1793_v27 = vadd.f32 %v228_v25, %v208_v26  ;;  %v1434_v28 = vpop.f32.mrb[1].mxu1 }
 0x1ee   :  { %v211_v29 = vpop.f32.mrb[2].mxu1 }
 0x1ef   :  { %v1356_v30 = vmul.f32 -1.442695, %v1793_v27  ;;  %v1796_v31 = vadd.f32 %v228_v25, %v211_v29  ;;  %v1435_v32 = vpop.f32.mrb[3].mxu1 }
 0x1f1   :  { %1475 = vpow2.f32 %v1356_v30 }
 0x1fb   :  { %v1476_v33 = vpop.eup %1475 }
 0x1fc   :  { %v274_v34 = vadd.f32 1.0, %v1476_v33 }
 0x1fe   :  { %1477 = vrcp.f32 %v274_v34 }
 0x208   :  { %v1478_v36 = vpop.eup %1477 }
 0x209   :  { %v277_v37 = vmul.f32 2.0, %v1478_v36 }
 0x20b   :  { %v1357_v39 = vadd.f32 -1.0, %v277_v37 }
 0x20d   :  { %v279_v40 = vsel %vm1802_vm5, %v1357_v39, %v1478_v36 }
 0x20e   :  { %282 = vrot.lane.b32.xlu0 %v279_v40, %s1667_s17  ;;  %v280_v43 = vmul.f32 0.0, %v279_v40 }
 0x280   :  { %v283_v41 = vpop.permute.xlu0 %282 }
 0x281   :  { %v285_v42 = vmul.f32 %v283_v41, %v279_v40 }
 0x283   :  { %287 = vrot.lane.b32.xlu0 %v285_v42, %s1674_s2 }
 0x2f5   :  { %v288_v44 = vpop.permute.xlu0 %287 }
 0x2f6   :  { %v1810_v45 = vadd.f32 %v288_v44, %v280_v43 }
 0x2f8   :  { %1479 = vtanh.f32 %v1810_v45  ;;  %v415_v29 = vrot.slane %v1810_v45, 6 }
 0x302   :  { %v1480_v53 = vpop.eup %1479 }
 0x303   :  { %293 = vrot.lane.b32.xlu1 %v1480_v53, %s1667_s17 }
 0x375   :  { %v294_v56 = vpop.permute.xlu1 %293 }
 0x376   :  { %v296_v57 = vmul.f32 %v294_v56, %v279_v40 }
 0x378   :  { %298 = vrot.lane.b32.xlu1 %v296_v57, %s1674_s2 }
 0x3ea   :  { %v299_v58 = vpop.permute.xlu1 %298 }
 0x3eb   :  { %v302_v59 = vsel %vm301_vm6, %v299_v58, 0.0 }
 0x3ec   :  { %v303_v60 = vpack.c.bf16 %v302_v59, %v302_v59 }
 0x3ee   :  { %1366 = vmatmul.mubr.msk.bf16.vlgmr.msra.gmra.mrb[4].mxu0 %vm170_vm2, %v303_v60 }
 0x3ef   :  { %589 = vmatpush1.bf16.msra.mxu0 %v1815_v47  ;;  %620 = vmatprep.mubr.bf16.mxu0 %v1675_v55 }
 0x3f0   :  { %590 = vmatprep.subr.bf16.mxu0 %v1817_v48 }
 0x3f3   :  { %591 = vmatpush1.bf16.msra.mxu0 %v1822_v49 }
 0x3f4   :  { %592 = vmatprep.subr.bf16.mxu0 %v1826_v50 }
 0x3f7   :  { %593 = vmatpush1.bf16.msra.mxu0 %v1830_v51 }
 0x3f8   :  { %594 = vmatprep.subr.bf16.mxu0 %v1834_v52 }
 0x3fb   :  { %595 = vmatpush1.bf16.msra.mxu0 %v1842_v54 }
 0x3fc   :  { %824 = vmatprep.subr.bf16.mxu0 %v1813_v46 }
 0x4c1   :  { %v381_v61 = vpop.f32.mrb[4].mxu0 }
 0x4c2   :  { %v390_v62 = vrot.slane %v381_v61, 6  ;;  %v383_v63 = vpop.f32.mrb[5].mxu0 }
 0x4c3   :  { %v391_v1 = vrot.slane %v383_v63, 6  ;;  %v385_v2 = vpop.f32.mrb[6].mxu0 }
 0x4c4   :  { %v394_v3 = vadd.f32 %v390_v62, %v1793_v27  ;;  %v386_v4 = vpop.f32.mrb[7].mxu0 }
 0x4c5   :  { %v395_v5 = vadd.f32 %v391_v1, %v1791_v23 }
 0x4c6   :  { %v1367_v6 = vmul.f32 -1.442695, %v394_v3 }
 0x4c7   :  { %v1368_v7 = vmul.f32 -1.442695, %v395_v5 }
 0x4c8   :  { %1481 = vpow2.f32 %v1367_v6 }
 0x4c9   :  { %1483 = vpow2.f32 %v1368_v7 }
 0x4d2   :  { %v1482_v8 = vpop.eup %1481 }
 0x4d3   :  { %v1484_v9 = vpop.eup %1483  ;;  %v402_v10 = vadd.f32 1.0, %v1482_v8 }
 0x4d4   :  { %v403_v11 = vadd.f32 1.0, %v1484_v9 }
 0x4d5   :  { %1485 = vrcp.f32 %v402_v10 }
 0x4d6   :  { %1487 = vrcp.f32 %v403_v11 }
 0x4df   :  { %v1486_v14 = vpop.eup %1485 }
 0x4e0   :  { %v1488_v15 = vpop.eup %1487  ;;  %v408_v16 = vmul.f32 2.0, %v1486_v14 }
 0x4e1   :  { %v409_v17 = vmul.f32 2.0, %v1488_v15 }
 0x4e2   :  { %v1369_v19 = vadd.f32 -1.0, %v408_v16 }
 0x4e3   :  { %v1370_v20 = vadd.f32 -1.0, %v409_v17 }
 0x4e4   :  { %v412_v21 = vsel %vm1802_vm5, %v1369_v19, %v1486_v14 }
 0x4e5   :  { %419 = vrot.lane.b32.xlu0 %v412_v21, %s1667_s17  ;;  %v413_v22 = vsel %vm1865_vm9, %v1370_v20, %v1488_v15  ;;  %v417_v30 = vmul.f32 %v415_v29, %v412_v21 }
 0x4e6   :  { %436 = vrot.lane.b32.xlu1 %v413_v22, %s1667_s17  ;;  %v434_v33 = vmul.f32 0.0, %v413_v22 }
 0x557   :  { %v420_v24 = vpop.permute.xlu0 %419 }
 0x558   :  { %v422_v25 = vmul.f32 %v420_v24, %v412_v21  ;;  %v437_v26 = vpop.permute.xlu1 %436 }
 0x559   :  { %v439_v28 = vmul.f32 %v437_v26, %v413_v22 }
 0x55a   :  { %424 = vrot.lane.b32.xlu0 %v422_v25, %s1674_s2 }
 0x55b   :  { %441 = vrot.lane.b32.xlu1 %v439_v28, %s1674_s2 }
 0x5cc   :  { %v425_v32 = vpop.permute.xlu0 %424 }
 0x5cd   :  { %v1878_v34 = vadd.f32 %v425_v32, %v417_v30  ;;  %v442_v35 = vpop.permute.xlu1 %441 }
 0x5ce   :  { %v1880_v36 = vadd.f32 %v442_v35, %v434_v33 }
 0x5cf   :  { %1489 = vtanh.f32 %v1878_v34 }
 0x5d0   :  { %1491 = vtanh.f32 %v1880_v36  ;;  %v554_v24 = vrot.slane %v1880_v36, 6 }
 0x5d9   :  { %v1490_v37 = vpop.eup %1489 }
 0x5da   :  { %v1492_v39 = vpop.eup %1491  ;;  %430 = vrot.lane.b32.xlu0 %v1490_v37, %s1667_s17 }
 0x5db   :  { %447 = vrot.lane.b32.xlu1 %v1492_v39, %s1667_s17 }
 0x64c   :  { %v431_v40 = vpop.permute.xlu0 %430 }
 0x64d   :  { %v433_v41 = vmul.f32 %v431_v40, %v412_v21  ;;  %v448_v42 = vpop.permute.xlu1 %447 }
 0x64e   :  { %v450_v43 = vmul.f32 %v448_v42, %v413_v22  ;;  %v534_v22 = vrot.slane %v1878_v34, 6 }
 0x64f   :  { %452 = vrot.lane.b32.xlu0 %v433_v41, %s1674_s2 }
 0x650   :  { %456 = vrot.lane.b32.xlu1 %v450_v43, %s1667_s17 }
 0x6c1   :  { %v453_v44 = vpop.permute.xlu0 %452 }
 0x6c2   :  { %v457_v45 = vpop.permute.xlu1 %456 }
 0x6c3   :  { %v459_v53 = vsel %vm301_vm6, %v453_v44, %v457_v45 }
 0x6c4   :  { %v460_v56 = vpack.c.bf16 %v459_v53, %v459_v53 }
 0x6c6   :  { %v462_v57 = vrot.slane %v460_v56, 1 }
 0x6c8   :  { %1371 = vmatmul.mubr.msk.bf16.vlgmr.msra.gmra.mrb[4].mxu1 %vm170_vm2, %v462_v57 }
 0x6c9   :  { %711 = vmatpush1.bf16.msra.mxu1 %v1815_v47  ;;  %742 = vmatprep.mubr.bf16.mxu1 %v1675_v55 }
 0x6ca   :  { %712 = vmatprep.subr.bf16.mxu1 %v1817_v48 }
 0x6cd   :  { %713 = vmatpush1.bf16.msra.mxu1 %v1822_v49 }
 0x6ce   :  { %714 = vmatprep.subr.bf16.mxu1 %v1826_v50 }
 0x6d1   :  { %715 = vmatpush1.bf16.msra.mxu1 %v1830_v51 }
 0x6d2   :  { %716 = vmatprep.subr.bf16.mxu1 %v1834_v52 }
 0x6d5   :  { %717 = vmatpush1.bf16.msra.mxu1 %v1842_v54 }
 0x6d6   :  { %946 = vmatprep.subr.bf16.mxu1 %v1813_v46 }
 0x79b   :  { %v500_v58 = vpop.f32.mrb[4].mxu1 }
 0x79c   :  { %v509_v59 = vrot.slane %v500_v58, 4  ;;  %v502_v60 = vpop.f32.mrb[5].mxu1 }
 0x79d   :  { %v510_v61 = vrot.slane %v502_v60, 4  ;;  %v504_v62 = vpop.f32.mrb[6].mxu1 }
 0x79e   :  { %v513_v63 = vadd.f32 %v509_v59, %v1793_v27  ;;  %v505_v1 = vpop.f32.mrb[7].mxu1 }
 0x79f   :  { %v514_v2 = vadd.f32 %v510_v61, %v1791_v23 }
 0x7a0   :  { %v1372_v3 = vmul.f32 -1.442695, %v513_v63 }
 0x7a1   :  { %v1373_v4 = vmul.f32 -1.442695, %v514_v2 }
 0x7a2   :  { %1493 = vpow2.f32 %v1372_v3 }
 0x7a3   :  { %1495 = vpow2.f32 %v1373_v4 }
 0x7ac   :  { %v1494_v5 = vpop.eup %1493 }
 0x7ad   :  { %v1496_v6 = vpop.eup %1495  ;;  %v521_v7 = vadd.f32 1.0, %v1494_v5 }
 0x7ae   :  { %v522_v8 = vadd.f32 1.0, %v1496_v6 }
 0x7af   :  { %1497 = vrcp.f32 %v521_v7 }
 0x7b0   :  { %1499 = vrcp.f32 %v522_v8 }
 0x7b9   :  { %v1498_v9 = vpop.eup %1497 }
 0x7ba   :  { %v1500_v10 = vpop.eup %1499  ;;  %v527_v11 = vmul.f32 2.0, %v1498_v9 }
 0x7bb   :  { %v528_v12 = vmul.f32 2.0, %v1500_v10 }
 0x7bc   :  { %v1374_v13 = vadd.f32 -1.0, %v527_v11 }
 0x7bd   :  { %v1375_v14 = vadd.f32 -1.0, %v528_v12 }
 0x7be   :  { %v531_v15 = vsel %vm1802_vm5, %v1374_v13, %v1498_v9 }
 0x7bf   :  { %538 = vrot.lane.b32.xlu0 %v531_v15, %s1667_s17  ;;  %v532_v16 = vsel %vm1865_vm9, %v1375_v14, %v1500_v10  ;;  %v536_v25 = vmul.f32 %v534_v22, %v531_v15 }
 0x7c0   :  { %558 = vrot.lane.b32.xlu1 %v532_v16, %s1667_s17  ;;  %v556_v28 = vmul.f32 %v554_v24, %v532_v16 }
 0x831   :  { %v539_v17 = vpop.permute.xlu0 %538 }
 0x832   :  { %v541_v19 = vmul.f32 %v539_v17, %v531_v15  ;;  %v559_v20 = vpop.permute.xlu1 %558 }
 0x833   :  { %v561_v21 = vmul.f32 %v559_v20, %v532_v16 }
 0x834   :  { %543 = vrot.lane.b32.xlu0 %v541_v19, %s1674_s2 }
 0x835   :  { %563 = vrot.lane.b32.xlu1 %v561_v21, %s1674_s2 }
 0x8a6   :  { %v544_v26 = vpop.permute.xlu0 %543 }
 0x8a7   :  { %v1911_v29 = vadd.f32 %v544_v26, %v536_v25  ;;  %v564_v30 = vpop.permute.xlu1 %563 }
 0x8a8   :  { %v1913_v32 = vadd.f32 %v564_v30, %v556_v28 }
 0x8a9   :  { %1501 = vtanh.f32 %v1911_v29 }
 0x8aa   :  { %1503 = vtanh.f32 %v1913_v32  ;;  %v676_v17 = vrot.slane %v1913_v32, 6 }
 0x8b3   :  { %v1502_v33 = vpop.eup %1501 }
 0x8b4   :  { %v1504_v35 = vpop.eup %1503  ;;  %549 = vrot.lane.b32.xlu0 %v1502_v33, %s1667_s17 }
 0x8b5   :  { %569 = vrot.lane.b32.xlu1 %v1504_v35, %s1667_s17 }
 0x926   :  { %v550_v34 = vpop.permute.xlu0 %549 }
 0x927   :  { %v552_v36 = vmul.f32 %v550_v34, %v531_v15  ;;  %v570_v37 = vpop.permute.xlu1 %569 }
 0x928   :  { %v572_v39 = vmul.f32 %v570_v37, %v532_v16  ;;  %v656_v16 = vrot.slane %v1911_v29, 6 }
 0x929   :  { %574 = vrot.lane.b32.xlu0 %v552_v36, %s1674_s2 }
 0x92a   :  { %578 = vrot.lane.b32.xlu1 %v572_v39, %s1667_s17 }
 0x99b   :  { %v575_v40 = vpop.permute.xlu0 %574 }
 0x99c   :  { %v579_v41 = vpop.permute.xlu1 %578 }
 0x99d   :  { %v581_v42 = vsel %vm301_vm6, %v575_v40, %v579_v41 }
 0x99e   :  { %v582_v43 = vpack.c.bf16 %v581_v42, %v581_v42 }
 0x9a0   :  { %v584_v44 = vrot.slane %v582_v43, 2 }
 0x9a2   :  { %1376 = vmatmul.mubr.msk.bf16.vlgmr.msra.gmra.mrb[8].mxu0 %vm170_vm2, %v584_v44 }
 0x9a3   :  { %825 = vmatpush1.bf16.msra.mxu0 %v1815_v47  ;;  %856 = vmatprep.mubr.bf16.mxu0 %v1675_v55 }
 0x9a4   :  { %826 = vmatprep.subr.bf16.mxu0 %v1817_v48 }
 0x9a7   :  { %827 = vmatpush1.bf16.msra.mxu0 %v1822_v49 }
 0x9a8   :  { %828 = vmatprep.subr.bf16.mxu0 %v1826_v50 }
 0x9ab   :  { %829 = vmatpush1.bf16.msra.mxu0 %v1830_v51 }
 0x9ac   :  { %830 = vmatprep.subr.bf16.mxu0 %v1834_v52 }
 0x9af   :  { %831 = vmatpush1.bf16.msra.mxu0 %v1842_v54 }
 0x9b0   :  { %1068 = vmatprep.subr.bf16.mxu0 %v1813_v46 }
 0xa75   :  { %v622_v45 = vpop.f32.mrb[8].mxu0 }
 0xa76   :  { %v631_v53 = vrot.slane %v622_v45, 2  ;;  %v624_v56 = vpop.f32.mrb[9].mxu0 }
 0xa77   :  { %v632_v57 = vrot.slane %v624_v56, 2  ;;  %v626_v58 = vpop.f32.mrb[10].mxu0 }
 0xa78   :  { %v635_v59 = vadd.f32 %v631_v53, %v1793_v27  ;;  %v627_v60 = vpop.f32.mrb[11].mxu0 }
 0xa79   :  { %v636_v61 = vadd.f32 %v632_v57, %v1791_v23 }
 0xa7a   :  { %v1377_v62 = vmul.f32 -1.442695, %v635_v59 }
 0xa7b   :  { %v1378_v63 = vmul.f32 -1.442695, %v636_v61 }
 0xa7c   :  { %1505 = vpow2.f32 %v1377_v62 }
 0xa7d   :  { %1507 = vpow2.f32 %v1378_v63 }
 0xa86   :  { %v1506_v1 = vpop.eup %1505 }
 0xa87   :  { %v1508_v2 = vpop.eup %1507  ;;  %v643_v3 = vadd.f32 1.0, %v1506_v1 }
 0xa88   :  { %v644_v4 = vadd.f32 1.0, %v1508_v2 }
 0xa89   :  { %1509 = vrcp.f32 %v643_v3 }
 0xa8a   :  { %1511 = vrcp.f32 %v644_v4 }
 0xa93   :  { %v1510_v5 = vpop.eup %1509 }
 0xa94   :  { %v1512_v6 = vpop.eup %1511  ;;  %v649_v7 = vmul.f32 2.0, %v1510_v5 }
 0xa95   :  { %v650_v8 = vmul.f32 2.0, %v1512_v6 }
 0xa96   :  { %v1379_v9 = vadd.f32 -1.0, %v649_v7 }
 0xa97   :  { %v1380_v10 = vadd.f32 -1.0, %v650_v8 }
 0xa98   :  { %v653_v27 = vsel %vm1802_vm5, %v1379_v9, %v1510_v5 }
 0xa99   :  { %660 = vrot.lane.b32.xlu0 %v653_v27, %s1667_s17  ;;  %v654_v11 = vsel %vm1865_vm9, %v1380_v10, %v1512_v6  ;;  %v658_v19 = vmul.f32 %v656_v16, %v653_v27 }
 0xa9a   :  { %680 = vrot.lane.b32.xlu1 %v654_v11, %s1667_s17  ;;  %v678_v21 = vmul.f32 %v676_v17, %v654_v11 }
 0xb0b   :  { %v661_v12 = vpop.permute.xlu0 %660 }
 0xb0c   :  { %v663_v13 = vmul.f32 %v661_v12, %v653_v27  ;;  %v681_v14 = vpop.permute.xlu1 %680 }
 0xb0d   :  { %v683_v15 = vmul.f32 %v681_v14, %v654_v11 }
 0xb0e   :  { %665 = vrot.lane.b32.xlu0 %v663_v13, %s1674_s2 }
 0xb0f   :  { %685 = vrot.lane.b32.xlu1 %v683_v15, %s1674_s2 }
 0xb80   :  { %v666_v20 = vpop.permute.xlu0 %665 }
 0xb81   :  { %v1944_v22 = vadd.f32 %v666_v20, %v658_v19  ;;  %v686_v24 = vpop.permute.xlu1 %685 }
 0xb82   :  { %v1946_v25 = vadd.f32 %v686_v24, %v678_v21 }
 0xb83   :  { %1513 = vtanh.f32 %v1944_v22  ;;  %v772_v9 = vrot.slane %v1944_v22, 6 }
 0xb84   :  { %1515 = vtanh.f32 %v1946_v25  ;;  %v792_v10 = vrot.slane %v1946_v25, 6 }
 0xb8d   :  { %v1514_v26 = vpop.eup %1513 }
 0xb8e   :  { %v1516_v28 = vpop.eup %1515  ;;  %671 = vrot.lane.b32.xlu0 %v1514_v26, %s1667_s17 }
 0xb8f   :  { %691 = vrot.lane.b32.xlu1 %v1516_v28, %s1667_s17 }
 0xc00   :  { %v672_v29 = vpop.permute.xlu0 %671 }
 0xc01   :  { %v674_v30 = vmul.f32 %v672_v29, %v653_v27  ;;  %v692_v32 = vpop.permute.xlu1 %691 }
 0xc02   :  { %v694_v33 = vmul.f32 %v692_v32, %v654_v11 }
 0xc03   :  { %696 = vrot.lane.b32.xlu0 %v674_v30, %s1674_s2 }
 0xc04   :  { %700 = vrot.lane.b32.xlu1 %v694_v33, %s1667_s17 }
 0xc75   :  { %v697_v35 = vpop.permute.xlu0 %696 }
 0xc76   :  { %v701_v34 = vpop.permute.xlu1 %700 }
 0xc77   :  { %v703_v36 = vsel %vm301_vm6, %v697_v35, %v701_v34 }
 0xc78   :  { %v704_v37 = vpack.c.bf16 %v703_v36, %v703_v36 }
 0xc7a   :  { %v706_v39 = vrot.slane %v704_v37, 3 }
 0xc7c   :  { %1381 = vmatmul.mubr.msk.bf16.vlgmr.msra.gmra.mrb[8].mxu1 %vm170_vm2, %v706_v39 }
 0xc7d   :  { %947 = vmatpush1.bf16.msra.mxu1 %v1815_v47  ;;  %978 = vmatprep.mubr.bf16.mxu1 %v1675_v55 }
 0xc7e   :  { %948 = vmatprep.subr.bf16.mxu1 %v1817_v48 }
 0xc81   :  { %949 = vmatpush1.bf16.msra.mxu1 %v1822_v49 }
 0xc82   :  { %950 = vmatprep.subr.bf16.mxu1 %v1826_v50 }
 0xc85   :  { %951 = vmatpush1.bf16.msra.mxu1 %v1830_v51 }
 0xc86   :  { %952 = vmatprep.subr.bf16.mxu1 %v1834_v52 }
 0xc89   :  { %953 = vmatpush1.bf16.msra.mxu1 %v1842_v54 }
 0xc8a   :  { %1190 = vmatprep.subr.bf16.mxu1 %v1813_v46 }
 0xd4f   :  { %v744_v40 = vpop.f32.mrb[8].mxu1 }
 0xd50   :  { %v751_v41 = vadd.f32 %v744_v40, %v1796_v31  ;;  %v746_v42 = vpop.f32.mrb[9].mxu1 }
 0xd51   :  { %v752_v43 = vadd.f32 %v746_v42, %v1791_v23  ;;  %v748_v44 = vpop.f32.mrb[10].mxu1 }
 0xd52   :  { %v1382_v45 = vmul.f32 -1.442695, %v751_v41  ;;  %v749_v53 = vpop.f32.mrb[11].mxu1 }
 0xd53   :  { %v1383_v56 = vmul.f32 -1.442695, %v752_v43 }
 0xd54   :  { %1517 = vpow2.f32 %v1382_v45 }
 0xd55   :  { %1519 = vpow2.f32 %v1383_v56 }
 0xd5e   :  { %v1518_v57 = vpop.eup %1517 }
 0xd5f   :  { %v1520_v58 = vpop.eup %1519  ;;  %v759_v59 = vadd.f32 1.0, %v1518_v57 }
 0xd60   :  { %v760_v60 = vadd.f32 1.0, %v1520_v58 }
 0xd61   :  { %1521 = vrcp.f32 %v759_v59 }
 0xd62   :  { %1523 = vrcp.f32 %v760_v60 }
 0xd6b   :  { %v1522_v61 = vpop.eup %1521 }
 0xd6c   :  { %v1524_v46 = vpop.eup %1523  ;;  %v765_v62 = vmul.f32 2.0, %v1522_v61 }
 0xd6d   :  { %v766_v63 = vmul.f32 2.0, %v1524_v46 }
 0xd6e   :  { %v1384_v1 = vadd.f32 -1.0, %v765_v62 }
 0xd6f   :  { %v1385_v2 = vadd.f32 -1.0, %v766_v63 }
 0xd70   :  { %v769_v3 = vsel %vm1802_vm5, %v1384_v1, %v1522_v61 }
 0xd71   :  { %776 = vrot.lane.b32.xlu0 %v769_v3, %s1667_s17  ;;  %v770_v4 = vsel %vm1865_vm9, %v1385_v2, %v1524_v46  ;;  %v774_v27 = vmul.f32 %v772_v9, %v769_v3 }
 0xd72   :  { %796 = vrot.lane.b32.xlu1 %v770_v4, %s1667_s17  ;;  %v794_v12 = vmul.f32 %v792_v10, %v770_v4 }
 0xde3   :  { %v777_v5 = vpop.permute.xlu0 %776 }
 0xde4   :  { %v779_v6 = vmul.f32 %v777_v5, %v769_v3  ;;  %v797_v7 = vpop.permute.xlu1 %796 }
 0xde5   :  { %v799_v8 = vmul.f32 %v797_v7, %v770_v4 }
 0xde6   :  { %781 = vrot.lane.b32.xlu0 %v779_v6, %s1674_s2 }
 0xde7   :  { %801 = vrot.lane.b32.xlu1 %v799_v8, %s1674_s2 }
 0xe58   :  { %v782_v11 = vpop.permute.xlu0 %781 }
 0xe59   :  { %v1977_v13 = vadd.f32 %v782_v11, %v774_v27  ;;  %v802_v14 = vpop.permute.xlu1 %801 }
 0xe5a   :  { %v1979_v15 = vadd.f32 %v802_v14, %v794_v12 }
 0xe5b   :  { %1525 = vtanh.f32 %v1977_v13  ;;  %v892_v2 = vrot.slane %v1977_v13, 6 }
 0xe5c   :  { %1527 = vtanh.f32 %v1979_v15 }
 0xe65   :  { %v1526_v16 = vpop.eup %1525 }
 0xe66   :  { %v1528_v17 = vpop.eup %1527  ;;  %787 = vrot.lane.b32.xlu0 %v1526_v16, %s1667_s17 }
 0xe67   :  { %807 = vrot.lane.b32.xlu1 %v1528_v17, %s1667_s17 }
 0xed8   :  { %v788_v19 = vpop.permute.xlu0 %787 }
 0xed9   :  { %v790_v20 = vmul.f32 %v788_v19, %v769_v3  ;;  %v808_v21 = vpop.permute.xlu1 %807  ;;  %v912_v3 = vrot.slane %v1979_v15, 6 }
 0xeda   :  { %v810_v22 = vmul.f32 %v808_v21, %v770_v4 }
 0xedb   :  { %812 = vrot.lane.b32.xlu0 %v790_v20, %s1674_s2 }
 0xedc   :  { %816 = vrot.lane.b32.xlu1 %v810_v22, %s1667_s17 }
 0xf4d   :  { %v813_v24 = vpop.permute.xlu0 %812 }
 0xf4e   :  { %v817_v25 = vpop.permute.xlu1 %816 }
 0xf4f   :  { %v819_v26 = vsel %vm301_vm6, %v813_v24, %v817_v25 }
 0xf50   :  { %v820_v28 = vpack.c.bf16 %v819_v26, %v819_v26 }
 0xf52   :  { %1386 = vmatmul.mubr.msk.bf16.vlgmr.msra.gmra.mrb[12].mxu0 %vm170_vm2, %v820_v28 }
 0xf53   :  { %1069 = vmatpush1.bf16.msra.mxu0 %v1815_v47  ;;  %1100 = vmatprep.mubr.bf16.mxu0 %v1675_v55 }
 0xf54   :  { %1070 = vmatprep.subr.bf16.mxu0 %v1817_v48 }
 0xf57   :  { %1071 = vmatpush1.bf16.msra.mxu0 %v1822_v49 }
 0xf58   :  { %1072 = vmatprep.subr.bf16.mxu0 %v1826_v50 }
 0xf5b   :  { %1073 = vmatpush1.bf16.msra.mxu0 %v1830_v51 }
 0xf5c   :  { %1074 = vmatprep.subr.bf16.mxu0 %v1834_v52 }
 0xf5f   :  { %1075 = vmatpush1.bf16.msra.mxu0 %v1842_v54 }
 0xf60   :  { %1436 = vmatprep.subr.bf16.mxu0 %v1672_v0 }
0x1025   :  { %v858_v29 = vpop.f32.mrb[12].mxu0 }
0x1026   :  { %v867_v30 = vrot.slane %v858_v29, 6  ;;  %v860_v32 = vpop.f32.mrb[13].mxu0 }
0x1027   :  { %v868_v33 = vrot.slane %v860_v32, 6  ;;  %v862_v35 = vpop.f32.mrb[14].mxu0 }
0x1028   :  { %v871_v34 = vadd.f32 %v867_v30, %v1796_v31  ;;  %v863_v36 = vpop.f32.mrb[15].mxu0 }
0x1029   :  { %v872_v37 = vadd.f32 %v868_v33, %v1791_v23 }
0x102a   :  { %v1387_v39 = vmul.f32 -1.442695, %v871_v34 }
0x102b   :  { %v1388_v40 = vmul.f32 -1.442695, %v872_v37 }
0x102c   :  { %1529 = vpow2.f32 %v1387_v39 }
0x102d   :  { %1531 = vpow2.f32 %v1388_v40 }
0x1036   :  { %v1530_v41 = vpop.eup %1529 }
0x1037   :  { %v1532_v42 = vpop.eup %1531  ;;  %v879_v43 = vadd.f32 1.0, %v1530_v41 }
0x1038   :  { %v880_v44 = vadd.f32 1.0, %v1532_v42 }
0x1039   :  { %1533 = vrcp.f32 %v879_v43 }
0x103a   :  { %1535 = vrcp.f32 %v880_v44 }
0x1043   :  { %v1534_v45 = vpop.eup %1533 }
0x1044   :  { %v1536_v53 = vpop.eup %1535  ;;  %v885_v56 = vmul.f32 2.0, %v1534_v45 }
0x1045   :  { %v886_v57 = vmul.f32 2.0, %v1536_v53 }
0x1046   :  { %v1389_v58 = vadd.f32 -1.0, %v885_v56 }
0x1047   :  { %v1390_v59 = vadd.f32 -1.0, %v886_v57 }
0x1048   :  { %v889_v60 = vsel %vm1802_vm5, %v1389_v58, %v1534_v45 }
0x1049   :  { %896 = vrot.lane.b32.xlu0 %v889_v60, %s1667_s17  ;;  %v890_v61 = vsel %vm1865_vm9, %v1390_v59, %v1536_v53  ;;  %v894_v4 = vmul.f32 %v892_v2, %v889_v60 }
0x104a   :  { %916 = vrot.lane.b32.xlu1 %v890_v61, %s1667_s17  ;;  %v914_v6 = vmul.f32 %v912_v3, %v890_v61 }
0x10bb   :  { %v897_v46 = vpop.permute.xlu0 %896 }
0x10bc   :  { %v899_v62 = vmul.f32 %v897_v46, %v889_v60  ;;  %v917_v63 = vpop.permute.xlu1 %916 }
0x10bd   :  { %v919_v1 = vmul.f32 %v917_v63, %v890_v61 }
0x10be   :  { %901 = vrot.lane.b32.xlu0 %v899_v62, %s1674_s2 }
0x10bf   :  { %921 = vrot.lane.b32.xlu1 %v919_v1, %s1674_s2 }
0x1130   :  { %v902_v5 = vpop.permute.xlu0 %901 }
0x1131   :  { %v2010_v7 = vadd.f32 %v902_v5, %v894_v4  ;;  %v922_v8 = vpop.permute.xlu1 %921 }
0x1132   :  { %v2012_v9 = vadd.f32 %v922_v8, %v914_v6 }
0x1133   :  { %1537 = vtanh.f32 %v2010_v7  ;;  %v1014_v43 = vrot.slane %v2010_v7, 6 }
0x1134   :  { %1539 = vtanh.f32 %v2012_v9  ;;  %v1034_v44 = vrot.slane %v2012_v9, 6 }
0x113d   :  { %v1538_v10 = vpop.eup %1537 }
0x113e   :  { %v1540_v27 = vpop.eup %1539  ;;  %907 = vrot.lane.b32.xlu0 %v1538_v10, %s1667_s17 }
0x113f   :  { %927 = vrot.lane.b32.xlu1 %v1540_v27, %s1667_s17 }
0x11b0   :  { %v908_v11 = vpop.permute.xlu0 %907 }
0x11b1   :  { %v910_v12 = vmul.f32 %v908_v11, %v889_v60  ;;  %v928_v13 = vpop.permute.xlu1 %927 }
0x11b2   :  { %v930_v14 = vmul.f32 %v928_v13, %v890_v61 }
0x11b3   :  { %932 = vrot.lane.b32.xlu0 %v910_v12, %s1674_s2 }
0x11b4   :  { %936 = vrot.lane.b32.xlu1 %v930_v14, %s1667_s17 }
0x1225   :  { %v933_v15 = vpop.permute.xlu0 %932 }
0x1226   :  { %v937_v16 = vpop.permute.xlu1 %936 }
0x1227   :  { %v939_v17 = vsel %vm301_vm6, %v933_v15, %v937_v16 }
0x1228   :  { %v940_v19 = vpack.c.bf16 %v939_v17, %v939_v17 }
0x122a   :  { %v942_v20 = vrot.slane %v940_v19, 1 }
0x122c   :  { %1391 = vmatmul.mubr.msk.bf16.vlgmr.msra.gmra.mrb[12].mxu1 %vm170_vm2, %v942_v20 }
0x122d   :  { %1191 = vmatpush1.bf16.msra.mxu1 %v1815_v47  ;;  %1222 = vmatprep.mubr.bf16.mxu1 %v1675_v55 }
0x122e   :  { %1192 = vmatprep.subr.bf16.mxu1 %v1817_v48 }
0x1231   :  { %1193 = vmatpush1.bf16.msra.mxu1 %v1822_v49 }
0x1232   :  { %1194 = vmatprep.subr.bf16.mxu1 %v1826_v50 }
0x1235   :  { %1195 = vmatpush1.bf16.msra.mxu1 %v1830_v51 }
0x1236   :  { %1196 = vmatprep.subr.bf16.mxu1 %v1834_v52 }
0x1239   :  { %1197 = vmatpush1.bf16.msra.mxu1 %v1842_v54 }
0x12ff   :  { %v980_v21 = vpop.f32.mrb[12].mxu1 }
0x1300   :  { %v989_v22 = vrot.slane %v980_v21, 4  ;;  %v982_v24 = vpop.f32.mrb[13].mxu1 }
0x1301   :  { %v990_v25 = vrot.slane %v982_v24, 4  ;;  %v984_v26 = vpop.f32.mrb[14].mxu1 }
0x1302   :  { %v993_v47 = vadd.f32 %v989_v22, %v1796_v31  ;;  %v985_v55 = vpop.f32.mrb[15].mxu1 }
0x1303   :  { %v994_v48 = vadd.f32 %v990_v25, %v1791_v23 }
0x1304   :  { %v1392_v28 = vmul.f32 -1.442695, %v993_v47 }
0x1305   :  { %v1393_v49 = vmul.f32 -1.442695, %v994_v48 }
0x1306   :  { %1541 = vpow2.f32 %v1392_v28 }
0x1307   :  { %1543 = vpow2.f32 %v1393_v49 }
0x1310   :  { %v1542_v50 = vpop.eup %1541 }
0x1311   :  { %v1544_v51 = vpop.eup %1543  ;;  %v1001_v29 = vadd.f32 1.0, %v1542_v50 }
0x1312   :  { %v1002_v52 = vadd.f32 1.0, %v1544_v51 }
0x1313   :  { %1545 = vrcp.f32 %v1001_v29 }
0x1314   :  { %1547 = vrcp.f32 %v1002_v52 }
0x131d   :  { %v1546_v54 = vpop.eup %1545 }
0x131e   :  { %v1548_v30 = vpop.eup %1547  ;;  %v1007_v32 = vmul.f32 2.0, %v1546_v54 }
0x131f   :  { %v1008_v33 = vmul.f32 2.0, %v1548_v30 }
0x1320   :  { %v1394_v35 = vadd.f32 -1.0, %v1007_v32 }
0x1321   :  { %v1395_v34 = vadd.f32 -1.0, %v1008_v33 }
0x1322   :  { %v1011_v36 = vsel %vm1802_vm5, %v1394_v35, %v1546_v54 }
0x1323   :  { %1018 = vrot.lane.b32.xlu0 %v1011_v36, %s1667_s17  ;;  %v1012_v37 = vsel %vm1865_vm9, %v1395_v34, %v1548_v30  ;;  %v1016_v45 = vmul.f32 %v1014_v43, %v1011_v36 }
0x1324   :  { %1038 = vrot.lane.b32.xlu1 %v1012_v37, %s1667_s17  ;;  %v1036_v56 = vmul.f32 %v1034_v44, %v1012_v37 }
0x1395   :  { %v1019_v39 = vpop.permute.xlu0 %1018 }
0x1396   :  { %v1021_v40 = vmul.f32 %v1019_v39, %v1011_v36  ;;  %v1039_v41 = vpop.permute.xlu1 %1038 }
0x1397   :  { %v1041_v42 = vmul.f32 %v1039_v41, %v1012_v37 }
0x1398   :  { %1023 = vrot.lane.b32.xlu0 %v1021_v40, %s1674_s2 }
0x1399   :  { %1043 = vrot.lane.b32.xlu1 %v1041_v42, %s1674_s2 }
0x140a   :  { %v1024_v53 = vpop.permute.xlu0 %1023 }
0x140b   :  { %v1026_v57 = vadd.f32 %v1024_v53, %v1016_v45  ;;  %v1044_v58 = vpop.permute.xlu1 %1043 }
0x140c   :  { %v1046_v59 = vadd.f32 %v1044_v58, %v1036_v56 }
0x140d   :  { %1549 = vtanh.f32 %v1026_v57  ;;  %v1136_v51 = vrot.slane %v1026_v57, 6 }
0x140e   :  { %1551 = vtanh.f32 %v1046_v59  ;;  %v1156_v29 = vrot.slane %v1046_v59, 6 }
0x1417   :  { %v1550_v60 = vpop.eup %1549 }
0x1418   :  { %v1552_v61 = vpop.eup %1551  ;;  %1029 = vrot.lane.b32.xlu0 %v1550_v60, %s1667_s17 }
0x1419   :  { %1049 = vrot.lane.b32.xlu1 %v1552_v61, %s1667_s17 }
0x148a   :  { %v1030_v46 = vpop.permute.xlu0 %1029 }
0x148b   :  { %v1032_v62 = vmul.f32 %v1030_v46, %v1011_v36  ;;  %v1050_v63 = vpop.permute.xlu1 %1049 }
0x148c   :  { %v1052_v1 = vmul.f32 %v1050_v63, %v1012_v37 }
0x148d   :  { %1054 = vrot.lane.b32.xlu0 %v1032_v62, %s1674_s2 }
0x148e   :  { %1058 = vrot.lane.b32.xlu1 %v1052_v1, %s1667_s17 }
0x14ff   :  { %v1055_v2 = vpop.permute.xlu0 %1054 }
0x1500   :  { %v1059_v3 = vpop.permute.xlu1 %1058 }
0x1501   :  { %v1061_v4 = vsel %vm301_vm6, %v1055_v2, %v1059_v3 }
0x1502   :  { %v1062_v5 = vpack.c.bf16 %v1061_v4, %v1061_v4 }
0x1504   :  { %v1064_v6 = vrot.slane %v1062_v5, 2 }
0x1506   :  { %1396 = vmatmul.mubr.msk.bf16.vlgmr.msra.gmra.mrb[16].mxu0 %vm170_vm2, %v1064_v6 }
0x1507   :  { %1440 = vmatprep.mubr.msk.bf16.mxu0 %vm1673_vm0, %v1672_v0 }
0x15d9   :  { %v1102_v7 = vpop.f32.mrb[16].mxu0 }
0x15da   :  { %v1111_v8 = vrot.slane %v1102_v7, 2  ;;  %v1104_v9 = vpop.f32.mrb[17].mxu0 }
0x15db   :  { %v1112_v10 = vrot.slane %v1104_v9, 2  ;;  %v1106_v27 = vpop.f32.mrb[18].mxu0 }
0x15dc   :  { %v1115_v11 = vadd.f32 %v1111_v8, %v1796_v31  ;;  %v1107_v12 = vpop.f32.mrb[19].mxu0  ;;  %v1473_v8 = vld [vmem:[%s2102_s6] sm:$0xff]   ;;  %s1338_s6 = sshll.u32 %s1676_s11, 4  ;;  %s1339_s6 = int_to_ptr.vmem [resolvable:$true] %s1338_s6 }
0x15dd   :  { %v1116_v13 = vadd.f32 %v1112_v10, %v1791_v23  ;;  %1437 = vmatpush3.bf16.msra.mxu0 %v1473_v8  ;;  %p1642_p11 = scmp.lt.s32.totalorder %s1339_s6, %s1339_s6 }
0x15de   :  { %v1397_v14 = vmul.f32 -1.442695, %v1115_v11  ;;  %1438 = vmatprep.subr.bf16.mxu0 %v1672_v0 }
0x15df   :  { %v1398_v15 = vmul.f32 -1.442695, %v1116_v13  ;;  %v1404_v13 = vld [vmem:[%s2103_s7] ss:$0 sm:$0xff] }
0x15e0   :  { %1553 = vpow2.f32 %v1397_v14 }
0x15e1   :  { %1555 = vpow2.f32 %v1398_v15  ;;  %1439 = vmatpush3.bf16.msra.mxu0 %v1474_v18 }
0x15ea   :  { %v1554_v16 = vpop.eup %1553 }
0x15eb   :  { %v1556_v17 = vpop.eup %1555  ;;  %v1123_v19 = vadd.f32 1.0, %v1554_v16 }
0x15ec   :  { %v1124_v20 = vadd.f32 1.0, %v1556_v17 }
0x15ed   :  { %1557 = vrcp.f32 %v1123_v19 }
0x15ee   :  { %1559 = vrcp.f32 %v1124_v20 }
0x15f7   :  { %v1558_v21 = vpop.eup %1557 }
0x15f8   :  { %v1560_v22 = vpop.eup %1559  ;;  %v1129_v24 = vmul.f32 2.0, %v1558_v21 }
0x15f9   :  { %v1130_v25 = vmul.f32 2.0, %v1560_v22 }
0x15fa   :  { %v1399_v26 = vadd.f32 -1.0, %v1129_v24 }
0x15fb   :  { %v1400_v47 = vadd.f32 -1.0, %v1130_v25 }
0x15fc   :  { %v1133_v31 = vsel %vm1802_vm5, %v1399_v26, %v1558_v21 }
0x15fd   :  { %1140 = vrot.lane.b32.xlu0 %v1133_v31, %s1667_s17  ;;  %v1134_v55 = vsel %vm1865_vm9, %v1400_v47, %v1560_v22  ;;  %v1138_v52 = vmul.f32 %v1136_v51, %v1133_v31 }
0x15fe   :  { %1160 = vrot.lane.b32.xlu1 %v1134_v55, %s1667_s17  ;;  %v1158_v54 = vmul.f32 %v1156_v29, %v1134_v55 }
0x166f   :  { %v1141_v48 = vpop.permute.xlu0 %1140 }
0x1670   :  { %v1143_v28 = vmul.f32 %v1141_v48, %v1133_v31  ;;  %v1161_v49 = vpop.permute.xlu1 %1160 }
0x1671   :  { %v1163_v50 = vmul.f32 %v1161_v49, %v1134_v55 }
0x1672   :  { %1145 = vrot.lane.b32.xlu0 %v1143_v28, %s1674_s2 }
0x1673   :  { %1165 = vrot.lane.b32.xlu1 %v1163_v50, %s1674_s2 }
0x16e4   :  { %v1146_v38 = vpop.permute.xlu0 %1145 }
0x16e5   :  { %v1148_v30 = vadd.f32 %v1146_v38, %v1138_v52  ;;  %v1166_v32 = vpop.permute.xlu1 %1165 }
0x16e6   :  { %v1168_v33 = vadd.f32 %v1166_v32, %v1158_v54 }
0x16e7   :  { %1561 = vtanh.f32 %v1148_v30 }
0x16e8   :  { %1563 = vtanh.f32 %v1168_v33 }
0x16f1   :  { %v1562_v35 = vpop.eup %1561 }
0x16f2   :  { %v1564_v34 = vpop.eup %1563  ;;  %1151 = vrot.lane.b32.xlu0 %v1562_v35, %s1667_s17 }
0x16f3   :  { %1171 = vrot.lane.b32.xlu1 %v1564_v34, %s1667_s17 }
0x1764   :  { %v1152_v36 = vpop.permute.xlu0 %1151 }
0x1765   :  { %v1154_v37 = vmul.f32 %v1152_v36, %v1133_v31  ;;  %v1172_v39 = vpop.permute.xlu1 %1171 }
0x1766   :  { %v1174_v40 = vmul.f32 %v1172_v39, %v1134_v55 }
0x1767   :  { %1176 = vrot.lane.b32.xlu0 %v1154_v37, %s1674_s2 }
0x1768   :  { %1180 = vrot.lane.b32.xlu1 %v1174_v40, %s1667_s17 }
0x17d9   :  { %v1177_v41 = vpop.permute.xlu0 %1176 }
0x17da   :  { %v1181_v42 = vpop.permute.xlu1 %1180 }
0x17db   :  { %v1183_v43 = vsel %vm301_vm6, %v1177_v41, %v1181_v42 }
0x17dc   :  { %v1184_v44 = vpack.c.bf16 %v1183_v43, %v1183_v43 }
0x17de   :  { %v1186_v45 = vrot.slane %v1184_v44, 3 }
0x17e0   :  { %1401 = vmatmul.mubr.msk.bf16.vlgmr.msra.gmra.mrb[16].mxu1 %vm170_vm2, %v1186_v45 }
0x18b3   :  { %v1224_v53 = vpop.f32.mrb[16].mxu1 }
0x18b4   :  { %v1225_v56 = vpop.f32.mrb[17].mxu1 }
0x18b5   :  { %v1230_v57 = vadd.f32 %v1225_v56, %v1791_v23  ;;  %v1227_v58 = vpop.f32.mrb[18].mxu1  ;;  %v1241_v23 = vrot.slane %v1168_v33, 6 }
0x18b6   :  { %v1228_v59 = vpop.f32.mrb[19].mxu1 }
0x18b7   :  { %v1402_v60 = vmul.f32 -1.442695, %v1230_v57 }
0x18b9   :  { %1565 = vpow2.f32 %v1402_v60 }
0x18c3   :  { %v1566_v61 = vpop.eup %1565 }
0x18c4   :  { %v1234_v46 = vadd.f32 1.0, %v1566_v61 }
0x18c6   :  { %1567 = vrcp.f32 %v1234_v46 }
0x18d0   :  { %v1568_v62 = vpop.eup %1567 }
0x18d1   :  { %v1237_v63 = vmul.f32 2.0, %v1568_v62 }
0x18d3   :  { %v1403_v1 = vadd.f32 -1.0, %v1237_v63 }
0x18d5   :  { %v1239_v2 = vsel %vm1865_vm9, %v1403_v1, %v1568_v62 }
0x18d6   :  { %1245 = vrot.lane.b32.xlu0 %v1239_v2, %s1667_s17  ;;  %v1243_v5 = vmul.f32 %v1241_v23, %v1239_v2 }
0x1948   :  { %v1246_v3 = vpop.permute.xlu0 %1245 }
0x1949   :  { %v1248_v4 = vmul.f32 %v1246_v3, %v1239_v2 }
0x194b   :  { %1250 = vrot.lane.b32.xlu1 %v1248_v4, %s1674_s2 }
0x19bd   :  { %v1251_v6 = vpop.permute.xlu1 %1250 }
0x19be   :  { %v1253_v7 = vadd.f32 %v1251_v6, %v1243_v5 }
0x19c0   :  { %1569 = vtanh.f32 %v1253_v7 }
0x19ca   :  { %v1570_v9 = vpop.eup %1569 }
0x19cb   :  { %1256 = vrot.lane.b32.xlu0 %v1570_v9, %s1667_s17  ;;  %s1637_s17 = scalar_lea.vmem %s1339_s6, 32 }
0x19cc   :  { %p1638_p10 = scmp.ne.s32.totalorder %s1339_s6, %s1637_s17  ;;  %p1643_p12 = scmp.lt.s32.totalorder %s1637_s17, %s1637_s17 }
0x19ce   :  { %p1644_p13 = por %p1643_p12, %p1642_p11 }
0x19d0   :  { %p1645_p0 = pnand %p1644_p13, %p1638_p10 }
0x1a3d   :  { %v1257_v10 = vpop.permute.xlu0 %1256 }
0x1a3e   :  { %v1259_v27 = vmul.f32 %v1257_v10, %v1239_v2 }
0x1a40   :  { %v1260_v11 = vpack.c.bf16 %v1259_v27, %v1259_v27 }
0x1a42   :  { %1273 = vrot.lane.b32.xlu1 %v1260_v11, %s1674_s2 }
0x1ab4   :  { %v1274_v12 = vpop.permute.xlu1 %1273 }
0x1ab5   :  { %1441 = vmatmul.mubr.msk.bf16.vlgmr.msra.gmra.mrb[20].mxu0 %vm301_vm6, %v1274_v12 }
0x1b88   :  { %v1324_v14 = vpop.f32.mrb[20].mxu0 }
0x1b89   :  { %v1325_v0 = vadd.f32 %v1404_v13, %v1324_v14  ;;  %v1442_v15 = vpop.f32.mrb[21].mxu0 }
0x1b8a   :  { %v1327_v16 = vpop.f32.mrb[22].mxu0 }
0x1b8b   :  { %v1443_v17 = vpop.f32.mrb[23].mxu0  ;;  %1331 = vst.msk [vmem:[#allocation8] sm:$0x3] %vm1330_vm10, %v1325_v0 }
0x1b8c   :  { %1648 = shalt.err (!%p1645_p0)
}
0x1b8d   :  { %s1649_s7 = scalar_lea.hbm %s2104_s8, 32 }
0x1b8e   :  { %p1650_p1 = scmp.ne.s32.totalorder %s2104_s8, %s1649_s7  ;;  %p1653_p2 = scmp.lt.u32.totalorder %s1649_s7, %s2104_s8 }
0x1b90   :  { %p1655_p3 = pnand %p1653_p2, %p1650_p1 }
0x1b92   :  { %1658 = shalt.err (!%p1655_p3)
}
0x1b93   :  { %1341 = dma.vmem_to_hbm [thread:$0]  %s1339_s6, 32, %s2104_s8, [#allocation4]  }
0x1b94   :  { %1663 = dma.done.wait [#allocation4], 32  }
0x1b95   :  { %1664 = vsyncadd [#allocation4], 4294967264 }
0x1b96   :  { %1345 = vsyncpa [#allocation3], 1 }
0x1b97   :  { %1346 = vsyncpa [#allocation6], 1 }
0x1b98   :  { %1347 = vsyncpa [#allocation4], 1 }

</bundles_post_ra>
